<compile_context>
chip_gen: v7x
topology: tpu7x:2x2x1
jax: 0.10.0
libtpu: 0.0.40
codegen_flags: <defaults>
</compile_context>

<pallas_src>
import functools

import jax
import jax.numpy as jnp
from jax import lax
from jax.experimental import pallas as pl
from jax.experimental.pallas import tpu as pltpu

_LANE = 128
_SUB = 8
_MXU_DTYPE = jnp.float32  # set to jnp.bfloat16 for ~3x fewer MXU passes (~1e-3 error)


def _round_up(x, m):
    return (x + m - 1) // m * m


# ---------------------------------------------------------------------------
# Kernel
# ---------------------------------------------------------------------------
def _gru_fc_kernel(x_ref, wih_ref, bih_ref, whh_ref, bhhn_ref,
                   fcwf_ref, fcwb_ref, fcb_ref, out_ref,
                   gx_scr, hA_scr, hB_scr, *, hidden):
    T, Bt, F = x_ref.shape
    G = hA_scr.shape[-1]               # combined fwd+bwd gate width (multiple of 128)
    Cp = out_ref.shape[-1]             # padded class count (multiple of 128)

    def mx(a):
        return a.astype(_MXU_DTYPE)

    # ---- input projection: one MXU matmul covers all timesteps & both directions ----
    x2d = x_ref[...].reshape(T * Bt, F)
    gx = (jnp.dot(mx(x2d), mx(wih_ref[...]), preferred_element_type=jnp.float32)
          + bih_ref[...])
    gx_scr[...] = gx.reshape(T, Bt, 3 * G)

    whh = mx(whh_ref[...])
    bhhn = jnp.broadcast_to(bhhn_ref[...], (Bt, G))            # hoisted out of the loop
    # within each gate block: lanes [0:hidden] = forward unit, [hidden:2*hidden] = backward
    fwd_lane = lax.broadcasted_iota(jnp.int32, (1, G), 1) < hidden

    def step(t, h):
        tr = T - 1 - t

        def gate_gx(gi):
            # per-gate loads (never the full [Bt, 3G] slab): fwd lanes come from x_t,
            # bwd lanes from x_{T-1-t}.
            c0 = gi * G
            a = gx_scr[t, :, c0:c0 + G]
            b = gx_scr[tr, :, c0:c0 + G]
            return jnp.where(fwd_lane, a, b)

        # fused fwd+bwd recurrence: one [Bt, G] @ [G, 3G] matmul per timestep
        gh = jnp.dot(mx(h), whh, preferred_element_type=jnp.float32)
        r = jax.nn.sigmoid(gate_gx(0) + gh[:, 0:G])
        z = jax.nn.sigmoid(gate_gx(1) + gh[:, G:2 * G])
        n = jnp.tanh(gate_gx(2) + r * (gh[:, 2 * G:3 * G] + bhhn))
        h_new = (1.0 - z) * n + z * h
        hA_scr[t] = h_new              # fwd half feeds output time t
        hB_scr[tr] = h_new             # bwd half feeds output time T-1-t
        return h_new

    h0 = jnp.zeros((Bt, G), jnp.float32)
    lax.fori_loop(0, T, step, h0, unroll=True if T <= 16 else 2)

    # ---- FC head (dropout is identity in eval mode); split weights avoid any concat ----
    # TODO(synk): training-mode dropout (Bernoulli mask) not implemented; eval semantics only.
    hA = hA_scr[...].reshape(T * Bt, G)
    hB = hB_scr[...].reshape(T * Bt, G)
    logits = (jnp.dot(mx(hA), mx(fcwf_ref[...]), preferred_element_type=jnp.float32)
              + jnp.dot(mx(hB), mx(fcwb_ref[...]), preferred_element_type=jnp.float32)
              + fcb_ref[...])
    out_ref[...] = logits.reshape(T, Bt, Cp)


# ---------------------------------------------------------------------------
# Weight packing (done once in the wrapper, plain XLA)
# ---------------------------------------------------------------------------
def _pack_params(params, F, H, C, G, Cp):
    f32 = jnp.float32
    wih_f = params["w_ih_f"].astype(f32); wih_b = params["w_ih_b"].astype(f32)
    whh_f = params["w_hh_f"].astype(f32); whh_b = params["w_hh_b"].astype(f32)
    bih_f = params["b_ih_f"].astype(f32); bih_b = params["b_ih_b"].astype(f32)
    bhh_f = params["b_hh_f"].astype(f32); bhh_b = params["b_hh_b"].astype(f32)
    fc_w = params["fc_w"].astype(f32); fc_b = params["fc_b"].astype(f32)

    gates = (slice(0, H), slice(H, 2 * H), slice(2 * H, 3 * H))   # r, z, n (PyTorch order)

    wih = jnp.zeros((F, 3 * G), f32)      # dense: x_t drives both directions' gate columns
    whh = jnp.zeros((G, 3 * G), f32)      # per-gate block-diagonal fwd/bwd recurrence
    bih = jnp.zeros((1, 3 * G), f32)
    for gi, sl in enumerate(gates):
        c0 = gi * G
        wih = wih.at[:, c0:c0 + H].set(wih_f[sl].T)
        wih = wih.at[:, c0 + H:c0 + 2 * H].set(wih_b[sl].T)
        whh = whh.at[0:H, c0:c0 + H].set(whh_f[sl].T)
        whh = whh.at[H:2 * H, c0 + H:c0 + 2 * H].set(whh_b[sl].T)
        # r/z-gate b_hh folds into the input-side bias; the n-gate b_hh stays separate
        # because PyTorch multiplies it by r.
        add_f = bhh_f[sl] if gi < 2 else jnp.zeros((H,), f32)
        add_b = bhh_b[sl] if gi < 2 else jnp.zeros((H,), f32)
        bih = bih.at[0, c0:c0 + H].set(bih_f[sl] + add_f)
        bih = bih.at[0, c0 + H:c0 + 2 * H].set(bih_b[sl] + add_b)

    bhhn = jnp.zeros((1, G), f32)
    bhhn = bhhn.at[0, 0:H].set(bhh_f[2 * H:3 * H])
    bhhn = bhhn.at[0, H:2 * H].set(bhh_b[2 * H:3 * H])

    # FC split into fwd / bwd contributions (no in-kernel concat), padded lane-dense.
    fcwf = jnp.zeros((G, Cp), f32).at[0:H, 0:C].set(fc_w[:, 0:H].T)
    fcwb = jnp.zeros((G, Cp), f32).at[H:2 * H, 0:C].set(fc_w[:, H:2 * H].T)
    fcb = jnp.zeros((1, Cp), f32).at[0, 0:C].set(fc_b)
    return wih, bih, whh, bhhn, fcwf, fcwb, fcb


# ---------------------------------------------------------------------------
# Generation-aware sizing helpers
# ---------------------------------------------------------------------------
def _vmem_budget_bytes():
    """Per-core VMEM budget: ~40 MiB on v7x (64 MiB/TC), ~80 MiB on v5e/v6e (128 MiB)."""
    cap = 128 * 1024 * 1024
    try:
        cap = int(pltpu.get_tpu_info().vmem_capacity_bytes)
    except Exception:
        pass
    return (cap * 5) // 8


def _has_two_tensorcores():
    try:
        return "v7" in jax.devices()[0].device_kind.lower()
    except Exception:
        return False


# ---------------------------------------------------------------------------
# Wrapper
# ---------------------------------------------------------------------------
def vanilla_gru_prediction(x, params):
    """x: [B, T, F] float32 -> {0: logits [B, T, C]}  (eval-mode VanillaGRUPrediction)."""
    B, T, F = x.shape
    H = params["w_hh_f"].shape[1]
    C = params["fc_w"].shape[0]

    G = _round_up(2 * H, _LANE)         # combined fwd+bwd lane block per gate
    Cp = _round_up(C, _LANE)            # lane-dense output stores

    budget = _vmem_budget_bytes()
    two_tc = _has_two_tensorcores()

    # Per-batch-row VMEM bytes: double-buffered x/out tiles + gx/hA/hB scratch.
    per_row = 4 * T * (2 * F + 2 * Cp + 5 * G)
    # Constant-index weights are still double-buffered by the pipeliner; budget for it.
    w_bytes = 4 * 2 * ((F + G + 1) * 3 * G + 2 * G * Cp + G + Cp)
    bt_cap = max(_SUB, ((budget - w_bytes) // max(per_row, 1)) // _SUB * _SUB)

    # Large batch tiles amortize the serial time loop and fill the 256-row MXU; ~256 is
    # past where the single EUP slot (2 sigmoid + 1 tanh per step) catches up with MXU time.
    Bt = min(_round_up(B, _SUB), 256, bt_cap)
    Bp = _round_up(B, Bt)
    if two_tc and Bp // Bt < 2 and Bp > _SUB:
        # v7x: make >=2 batch tiles so dimension_semantics=("parallel",) uses both TCs.
        Bt = max(_SUB, _round_up(pl.cdiv(Bp, 2), _SUB))
        Bp = _round_up(B, Bt)
    n_btiles = Bp // Bt

    wih, bih, whh, bhhn, fcwf, fcwb, fcb = _pack_params(params, F, H, C, G, Cp)

    # [B, T, F] -> [T, Bp, F]: single pass, no input duplication / concat.
    xt = jnp.transpose(x.astype(jnp.float32), (1, 0, 2))
    xt = jnp.pad(xt, ((0, 0), (0, Bp - B), (0, 0)))

    def const_spec(arr):
        nd = arr.ndim

        def imap(b, _n=nd):
            return (0,) * _n

        return pl.BlockSpec(arr.shape, imap)

    in_specs = [pl.BlockSpec((T, Bt, F), lambda b: (0, b, 0)),
                const_spec(wih), const_spec(bih), const_spec(whh), const_spec(bhhn),
                const_spec(fcwf), const_spec(fcwb), const_spec(fcb)]
    out_spec = pl.BlockSpec((T, Bt, Cp), lambda b: (0, b, 0))

    scratch = [pltpu.VMEM((T, Bt, 3 * G), jnp.float32),   # gate projections of x
               pltpu.VMEM((T, Bt, G), jnp.float32),       # h at step t      (fwd output)
               pltpu.VMEM((T, Bt, G), jnp.float32)]       # h at step T-1-t  (bwd output)

    est = per_row * Bt + w_bytes
    vmem_limit = int(min(max(2 * est, 16 * 2 ** 20), budget))

    out = pl.pallas_call(
        functools.partial(_gru_fc_kernel, hidden=H),
        out_shape=jax.ShapeDtypeStruct((T, Bp, Cp), jnp.float32),
        grid=(n_btiles,),
        in_specs=in_specs,
        out_specs=out_spec,
        scratch_shapes=scratch,
        compiler_params=pltpu.CompilerParams(
            dimension_semantics=("parallel",),
            vmem_limit_bytes=vmem_limit),
    )(xt, wih, bih, whh, bhhn, fcwf, fcwb, fcb)

    # Slice the padding away BEFORE the transpose (Cp/C x Bp/B fewer bytes moved).
    logits = jnp.transpose(out[:, :B, :C], (1, 0, 2))
    return {0: logits}


# ---------------------------------------------------------------------------
# Params init + pure-JAX reference (PyTorch GRU + Linear semantics)
# ---------------------------------------------------------------------------
def init_params(key, F, H, C):
    ks = jax.random.split(key, 10)
    k_gru = 1.0 / (H ** 0.5)
    k_fc = 1.0 / ((2 * H) ** 0.5)
    u = lambda k, shape, b: jax.random.uniform(k, shape, jnp.float32, -b, b)
    return {
        "w_ih_f": u(ks[0], (3 * H, F), k_gru),
        "w_hh_f": u(ks[1], (3 * H, H), k_gru),
        "b_ih_f": u(ks[2], (3 * H,), k_gru),
        "b_hh_f": u(ks[3], (3 * H,), k_gru),
        "w_ih_b": u(ks[4], (3 * H, F), k_gru),
        "w_hh_b": u(ks[5], (3 * H, H), k_gru),
        "b_ih_b": u(ks[6], (3 * H,), k_gru),
        "b_hh_b": u(ks[7], (3 * H,), k_gru),
        "fc_w": u(ks[8], (C, 2 * H), k_fc),
        "fc_b": u(ks[9], (C,), k_fc),
    }


def reference(x, params):
    B, T, F = x.shape
    H = params["w_hh_f"].shape[1]

    def run_dir(w_ih, w_hh, b_ih, b_hh, reverse):
        h = jnp.zeros((B, H), jnp.float32)
        out = [None] * T
        order = range(T - 1, -1, -1) if reverse else range(T)
        for t in order:
            gx = x[:, t, :] @ w_ih.T + b_ih
            gh = h @ w_hh.T + b_hh
            r = jax.nn.sigmoid(gx[:, :H] + gh[:, :H])
            z = jax.nn.sigmoid(gx[:, H:2 * H] + gh[:, H:2 * H])
            n = jnp.tanh(gx[:, 2 * H:] + r * gh[:, 2 * H:])
            h = (1.0 - z) * n + z * h
            out[t] = h
        return jnp.stack(out, axis=1)

    hf = run_dir(params["w_ih_f"], params["w_hh_f"],
                 params["b_ih_f"], params["b_hh_f"], reverse=False)
    hb = run_dir(params["w_ih_b"], params["w_hh_b"],
                 params["b_ih_b"], params["b_hh_b"], reverse=True)
    feats = jnp.concatenate([hf, hb], axis=-1)
    logits = feats.reshape(B * T, 2 * H) @ params["fc_w"].T + params["fc_b"]
    return logits.reshape(B, T, -1)


if __name__ == "__main__":
    B, T, F, H, C = 2, 8, 16, 32, 8
    key = jax.random.PRNGKey(0)
    kx, kp = jax.random.split(key)
    x = jax.random.normal(kx, (B, T, F), dtype=jnp.float32)
    params = init_params(kp, F, H, C)

    out = vanilla_gru_prediction(x, params)
    logits = jax.block_until_ready(out[0])
    assert logits.shape == (B, T, C)

    ref = reference(x, params)
    assert jnp.allclose(logits, ref, atol=1e-4, rtol=1e-4), "mismatch vs reference"

    print("KERNEL_OK")
</pallas_src>

<mosaic_0001>
module attributes {stable_mosaic.version = 11 : i64} {
  func.func @_gru_fc_kernel(%arg0: i32, %arg1: memref<8x8x16xf32, #tpu.memory_space<vmem>>, %arg2: memref<16x384xf32, #tpu.memory_space<vmem>>, %arg3: memref<1x384xf32, #tpu.memory_space<vmem>>, %arg4: memref<128x384xf32, #tpu.memory_space<vmem>>, %arg5: memref<1x128xf32, #tpu.memory_space<vmem>>, %arg6: memref<128x128xf32, #tpu.memory_space<vmem>>, %arg7: memref<128x128xf32, #tpu.memory_space<vmem>>, %arg8: memref<1x128xf32, #tpu.memory_space<vmem>>, %arg9: memref<8x8x128xf32, #tpu.memory_space<vmem>>, %arg10: memref<8x8x384xf32, #tpu.memory_space<vmem>>, %arg11: memref<8x8x128xf32, #tpu.memory_space<vmem>>, %arg12: memref<8x8x128xf32, #tpu.memory_space<vmem>>) attributes {dimension_semantics = [#tpu.dimension_semantics<parallel>], iteration_bounds = array<i64: 1>, scalar_prefetch = 0 : i64, scratch_operands = 3 : i64, tpu.core_type = #tpu.core_type<tc>, window_params = [{transform_indices = @transform_0, window_bounds = array<i64: 8, 8, 16>}, {pipeline_mode = #tpu.pipeline_mode<synchronous>, transform_indices = @transform_1, window_bounds = array<i64: 16, 384>}, {pipeline_mode = #tpu.pipeline_mode<synchronous>, transform_indices = @transform_2, window_bounds = array<i64: 1, 384>}, {pipeline_mode = #tpu.pipeline_mode<synchronous>, transform_indices = @transform_3, window_bounds = array<i64: 128, 384>}, {pipeline_mode = #tpu.pipeline_mode<synchronous>, transform_indices = @transform_4, window_bounds = array<i64: 1, 128>}, {pipeline_mode = #tpu.pipeline_mode<synchronous>, transform_indices = @transform_5, window_bounds = array<i64: 128, 128>}, {pipeline_mode = #tpu.pipeline_mode<synchronous>, transform_indices = @transform_6, window_bounds = array<i64: 128, 128>}, {pipeline_mode = #tpu.pipeline_mode<synchronous>, transform_indices = @transform_7, window_bounds = array<i64: 1, 128>}, {transform_indices = @transform_8, window_bounds = array<i64: 8, 8, 128>}]} {
    %c0 = arith.constant 0 : index
    %c0_0 = arith.constant 0 : index
    %c0_1 = arith.constant 0 : index
    %0 = vector.load %arg1[%c0, %c0_0, %c0_1] : memref<8x8x16xf32, #tpu.memory_space<vmem>>, vector<8x8x16xf32>
    %1 = vector.shape_cast %0 : vector<8x8x16xf32> to vector<64x16xf32>
    %c0_2 = arith.constant 0 : index
    %c0_3 = arith.constant 0 : index
    %2 = vector.load %arg2[%c0_2, %c0_3] : memref<16x384xf32, #tpu.memory_space<vmem>>, vector<16x384xf32>
    %cst = arith.constant dense<0.000000e+00> : vector<64x384xf32>
    %3 = tpu.matmul %1, %2, %cst {dimension_numbers = #tpu.dot_dimension_numbers<[1], [0], [0], [1], [0, 0, 1, 1], [], []>} : vector<64x16xf32>, vector<16x384xf32>, vector<64x384xf32> -> vector<64x384xf32>
    %c0_4 = arith.constant 0 : index
    %c0_5 = arith.constant 0 : index
    %4 = vector.load %arg3[%c0_4, %c0_5] : memref<1x384xf32, #tpu.memory_space<vmem>>, vector<1x384xf32>
    %5 = vector.broadcast %4 : vector<1x384xf32> to vector<64x384xf32>
    %6 = arith.addf %3, %5 : vector<64x384xf32>
    %7 = vector.shape_cast %6 : vector<64x384xf32> to vector<8x8x384xf32>
    %c0_6 = arith.constant 0 : index
    %c0_7 = arith.constant 0 : index
    %c0_8 = arith.constant 0 : index
    %8 = vector.load %arg10[%c0_6, %c0_7, %c0_8] : memref<8x8x384xf32, #tpu.memory_space<vmem>>, vector<8x8x384xf32>
    tpu.vector_store %arg10[%c0_6, %c0_7, %c0_8], %7 {strides = array<i32>} : memref<8x8x384xf32, #tpu.memory_space<vmem>>, vector<8x8x384xf32>,
    %c0_9 = arith.constant 0 : index
    %c0_10 = arith.constant 0 : index
    %9 = vector.load %arg4[%c0_9, %c0_10] : memref<128x384xf32, #tpu.memory_space<vmem>>, vector<128x384xf32>
    %c0_11 = arith.constant 0 : index
    %c0_12 = arith.constant 0 : index
    %10 = vector.load %arg5[%c0_11, %c0_12] : memref<1x128xf32, #tpu.memory_space<vmem>>, vector<1x128xf32>
    %11 = vector.shape_cast %10 : vector<1x128xf32> to vector<1x128xf32>
    %12 = vector.broadcast %11 : vector<1x128xf32> to vector<8x128xf32>
    %13 = tpu.iota {dimensions = array<i32: 1>} : vector<1x128xi32>
    %c32_i32 = arith.constant 32 : i32
    %14 = vector.broadcast %c32_i32 : i32 to vector<1x128xi32>
    %15 = arith.cmpi slt, %13, %14 : vector<1x128xi32>
    %cst_13 = arith.constant 0.000000e+00 : f32
    %16 = vector.broadcast %cst_13 : f32 to vector<8x128xf32>
    %c0_i32 = arith.constant 0 : i32
    %c7_i32 = arith.constant 7 : i32
    %17 = arith.subi %c7_i32, %c0_i32 : i32
    %cst_14 = arith.constant dense<0.000000e+00> : vector<8x384xf32>
    %18 = tpu.matmul %16, %9, %cst_14 {dimension_numbers = #tpu.dot_dimension_numbers<[1], [0], [0], [1], [0, 0, 1, 1], [], []>} : vector<8x128xf32>, vector<128x384xf32>, vector<8x384xf32> -> vector<8x384xf32>
    %19 = arith.index_cast %c0_i32 : i32 to index
    %c0_15 = arith.constant 0 : index
    %c0_16 = arith.constant 0 : index
    %20 = vector.load %arg10[%19, %c0_15, %c0_16] : memref<8x8x384xf32, #tpu.memory_space<vmem>>, vector<1x8x128xf32>
    %21 = vector.shape_cast %20 : vector<1x8x128xf32> to vector<8x128xf32>
    %22 = arith.index_cast %17 : i32 to index
    %c0_17 = arith.constant 0 : index
    %c0_18 = arith.constant 0 : index
    %23 = vector.load %arg10[%22, %c0_17, %c0_18] : memref<8x8x384xf32, #tpu.memory_space<vmem>>, vector<1x8x128xf32>
    %24 = vector.shape_cast %23 : vector<1x8x128xf32> to vector<8x128xf32>
    %25 = vector.shape_cast %15 : vector<1x128xi1> to vector<1x128xi1>
    %26 = vector.broadcast %25 : vector<1x128xi1> to vector<8x128xi1>
    %27 = arith.select %26, %21, %24 : vector<8x128xi1>, vector<8x128xf32>
    %28 = vector.extract_strided_slice %18 {offsets = [0, 0], sizes = [8, 128], strides = [1, 1]} : vector<8x384xf32> to vector<8x128xf32>
    %29 = arith.addf %27, %28 : vector<8x128xf32>
    %30 = arith.negf %29 : vector<8x128xf32>
    %31 = math.exp %30 : vector<8x128xf32>
    %cst_19 = arith.constant 1.000000e+00 : f32
    %32 = vector.broadcast %cst_19 : f32 to vector<8x128xf32>
    %33 = arith.addf %32, %31 : vector<8x128xf32>
    %34 = arith.divf %32, %33 : vector<8x128xf32>
    %35 = arith.index_cast %c0_i32 : i32 to index
    %c0_20 = arith.constant 0 : index
    %c128 = arith.constant 128 : index
    %36 = vector.load %arg10[%35, %c0_20, %c128] : memref<8x8x384xf32, #tpu.memory_space<vmem>>, vector<1x8x128xf32>
    %37 = vector.shape_cast %36 : vector<1x8x128xf32> to vector<8x128xf32>
    %38 = arith.index_cast %17 : i32 to index
    %c0_21 = arith.constant 0 : index
    %c128_22 = arith.constant 128 : index
    %39 = vector.load %arg10[%38, %c0_21, %c128_22] : memref<8x8x384xf32, #tpu.memory_space<vmem>>, vector<1x8x128xf32>
    %40 = vector.shape_cast %39 : vector<1x8x128xf32> to vector<8x128xf32>
    %41 = vector.shape_cast %15 : vector<1x128xi1> to vector<1x128xi1>
    %42 = vector.broadcast %41 : vector<1x128xi1> to vector<8x128xi1>
    %43 = arith.select %42, %37, %40 : vector<8x128xi1>, vector<8x128xf32>
    %44 = vector.extract_strided_slice %18 {offsets = [0, 128], sizes = [8, 128], strides = [1, 1]} : vector<8x384xf32> to vector<8x128xf32>
    %45 = arith.addf %43, %44 : vector<8x128xf32>
    %46 = arith.negf %45 : vector<8x128xf32>
    %47 = math.exp %46 : vector<8x128xf32>
    %cst_23 = arith.constant 1.000000e+00 : f32
    %48 = vector.broadcast %cst_23 : f32 to vector<8x128xf32>
    %49 = arith.addf %48, %47 : vector<8x128xf32>
    %50 = arith.divf %48, %49 : vector<8x128xf32>
    %51 = arith.index_cast %c0_i32 : i32 to index
    %c0_24 = arith.constant 0 : index
    %c256 = arith.constant 256 : index
    %52 = vector.load %arg10[%51, %c0_24, %c256] : memref<8x8x384xf32, #tpu.memory_space<vmem>>, vector<1x8x128xf32>
    %53 = vector.shape_cast %52 : vector<1x8x128xf32> to vector<8x128xf32>
    %54 = arith.index_cast %17 : i32 to index
    %c0_25 = arith.constant 0 : index
    %c256_26 = arith.constant 256 : index
    %55 = vector.load %arg10[%54, %c0_25, %c256_26] : memref<8x8x384xf32, #tpu.memory_space<vmem>>, vector<1x8x128xf32>
    %56 = vector.shape_cast %55 : vector<1x8x128xf32> to vector<8x128xf32>
    %57 = vector.shape_cast %15 : vector<1x128xi1> to vector<1x128xi1>
    %58 = vector.broadcast %57 : vector<1x128xi1> to vector<8x128xi1>
    %59 = arith.select %58, %53, %56 : vector<8x128xi1>, vector<8x128xf32>
    %60 = vector.extract_strided_slice %18 {offsets = [0, 256], sizes = [8, 128], strides = [1, 1]} : vector<8x384xf32> to vector<8x128xf32>
    %61 = arith.addf %60, %12 : vector<8x128xf32>
    %62 = arith.mulf %34, %61 : vector<8x128xf32>
    %63 = arith.addf %59, %62 : vector<8x128xf32>
    %64 = math.tanh %63 : vector<8x128xf32>
    %cst_27 = arith.constant 1.000000e+00 : f32
    %65 = vector.broadcast %cst_27 : f32 to vector<8x128xf32>
    %66 = arith.subf %65, %50 : vector<8x128xf32>
    %67 = arith.mulf %66, %64 : vector<8x128xf32>
    %68 = arith.mulf %50, %16 : vector<8x128xf32>
    %69 = arith.addf %67, %68 : vector<8x128xf32>
    %70 = arith.index_cast %c0_i32 : i32 to index
    %c0_28 = arith.constant 0 : index
    %c0_29 = arith.constant 0 : index
    %71 = vector.load %arg11[%70, %c0_28, %c0_29] : memref<8x8x128xf32, #tpu.memory_space<vmem>>, vector<1x8x128xf32>
    %72 = vector.shape_cast %71 : vector<1x8x128xf32> to vector<8x128xf32>
    %73 = vector.shape_cast %69 : vector<8x128xf32> to vector<1x8x128xf32>
    tpu.vector_store %arg11[%70, %c0_28, %c0_29], %73 {strides = array<i32>} : memref<8x8x128xf32, #tpu.memory_space<vmem>>, vector<1x8x128xf32>,
    %74 = arith.index_cast %17 : i32 to index
    %c0_30 = arith.constant 0 : index
    %c0_31 = arith.constant 0 : index
    %75 = vector.load %arg12[%74, %c0_30, %c0_31] : memref<8x8x128xf32, #tpu.memory_space<vmem>>, vector<1x8x128xf32>
    %76 = vector.shape_cast %75 : vector<1x8x128xf32> to vector<8x128xf32>
    %77 = vector.shape_cast %69 : vector<8x128xf32> to vector<1x8x128xf32>
    tpu.vector_store %arg12[%74, %c0_30, %c0_31], %77 {strides = array<i32>} : memref<8x8x128xf32, #tpu.memory_space<vmem>>, vector<1x8x128xf32>,
    %c1_i32 = arith.constant 1 : i32
    %c7_i32_32 = arith.constant 7 : i32
    %78 = arith.subi %c7_i32_32, %c1_i32 : i32
    %cst_33 = arith.constant dense<0.000000e+00> : vector<8x384xf32>
    %79 = tpu.matmul %69, %9, %cst_33 {dimension_numbers = #tpu.dot_dimension_numbers<[1], [0], [0], [1], [0, 0, 1, 1], [], []>} : vector<8x128xf32>, vector<128x384xf32>, vector<8x384xf32> -> vector<8x384xf32>
    %80 = arith.index_cast %c1_i32 : i32 to index
    %c0_34 = arith.constant 0 : index
    %c0_35 = arith.constant 0 : index
    %81 = vector.load %arg10[%80, %c0_34, %c0_35] : memref<8x8x384xf32, #tpu.memory_space<vmem>>, vector<1x8x128xf32>
    %82 = vector.shape_cast %81 : vector<1x8x128xf32> to vector<8x128xf32>
    %83 = arith.index_cast %78 : i32 to index
    %c0_36 = arith.constant 0 : index
    %c0_37 = arith.constant 0 : index
    %84 = vector.load %arg10[%83, %c0_36, %c0_37] : memref<8x8x384xf32, #tpu.memory_space<vmem>>, vector<1x8x128xf32>
    %85 = vector.shape_cast %84 : vector<1x8x128xf32> to vector<8x128xf32>
    %86 = vector.shape_cast %15 : vector<1x128xi1> to vector<1x128xi1>
    %87 = vector.broadcast %86 : vector<1x128xi1> to vector<8x128xi1>
    %88 = arith.select %87, %82, %85 : vector<8x128xi1>, vector<8x128xf32>
    %89 = vector.extract_strided_slice %79 {offsets = [0, 0], sizes = [8, 128], strides = [1, 1]} : vector<8x384xf32> to vector<8x128xf32>
    %90 = arith.addf %88, %89 : vector<8x128xf32>
    %91 = arith.negf %90 : vector<8x128xf32>
    %92 = math.exp %91 : vector<8x128xf32>
    %cst_38 = arith.constant 1.000000e+00 : f32
    %93 = vector.broadcast %cst_38 : f32 to vector<8x128xf32>
    %94 = arith.addf %93, %92 : vector<8x128xf32>
    %95 = arith.divf %93, %94 : vector<8x128xf32>
    %96 = arith.index_cast %c1_i32 : i32 to index
    %c0_39 = arith.constant 0 : index
    %c128_40 = arith.constant 128 : index
    %97 = vector.load %arg10[%96, %c0_39, %c128_40] : memref<8x8x384xf32, #tpu.memory_space<vmem>>, vector<1x8x128xf32>
    %98 = vector.shape_cast %97 : vector<1x8x128xf32> to vector<8x128xf32>
    %99 = arith.index_cast %78 : i32 to index
    %c0_41 = arith.constant 0 : index
    %c128_42 = arith.constant 128 : index
    %100 = vector.load %arg10[%99, %c0_41, %c128_42] : memref<8x8x384xf32, #tpu.memory_space<vmem>>, vector<1x8x128xf32>
    %101 = vector.shape_cast %100 : vector<1x8x128xf32> to vector<8x128xf32>
    %102 = vector.shape_cast %15 : vector<1x128xi1> to vector<1x128xi1>
    %103 = vector.broadcast %102 : vector<1x128xi1> to vector<8x128xi1>
    %104 = arith.select %103, %98, %101 : vector<8x128xi1>, vector<8x128xf32>
    %105 = vector.extract_strided_slice %79 {offsets = [0, 128], sizes = [8, 128], strides = [1, 1]} : vector<8x384xf32> to vector<8x128xf32>
    %106 = arith.addf %104, %105 : vector<8x128xf32>
    %107 = arith.negf %106 : vector<8x128xf32>
    %108 = math.exp %107 : vector<8x128xf32>
    %cst_43 = arith.constant 1.000000e+00 : f32
    %109 = vector.broadcast %cst_43 : f32 to vector<8x128xf32>
    %110 = arith.addf %109, %108 : vector<8x128xf32>
    %111 = arith.divf %109, %110 : vector<8x128xf32>
    %112 = arith.index_cast %c1_i32 : i32 to index
    %c0_44 = arith.constant 0 : index
    %c256_45 = arith.constant 256 : index
    %113 = vector.load %arg10[%112, %c0_44, %c256_45] : memref<8x8x384xf32, #tpu.memory_space<vmem>>, vector<1x8x128xf32>
    %114 = vector.shape_cast %113 : vector<1x8x128xf32> to vector<8x128xf32>
    %115 = arith.index_cast %78 : i32 to index
    %c0_46 = arith.constant 0 : index
    %c256_47 = arith.constant 256 : index
    %116 = vector.load %arg10[%115, %c0_46, %c256_47] : memref<8x8x384xf32, #tpu.memory_space<vmem>>, vector<1x8x128xf32>
    %117 = vector.shape_cast %116 : vector<1x8x128xf32> to vector<8x128xf32>
    %118 = vector.shape_cast %15 : vector<1x128xi1> to vector<1x128xi1>
    %119 = vector.broadcast %118 : vector<1x128xi1> to vector<8x128xi1>
    %120 = arith.select %119, %114, %117 : vector<8x128xi1>, vector<8x128xf32>
    %121 = vector.extract_strided_slice %79 {offsets = [0, 256], sizes = [8, 128], strides = [1, 1]} : vector<8x384xf32> to vector<8x128xf32>
    %122 = arith.addf %121, %12 : vector<8x128xf32>
    %123 = arith.mulf %95, %122 : vector<8x128xf32>
    %124 = arith.addf %120, %123 : vector<8x128xf32>
    %125 = math.tanh %124 : vector<8x128xf32>
    %cst_48 = arith.constant 1.000000e+00 : f32
    %126 = vector.broadcast %cst_48 : f32 to vector<8x128xf32>
    %127 = arith.subf %126, %111 : vector<8x128xf32>
    %128 = arith.mulf %127, %125 : vector<8x128xf32>
    %129 = arith.mulf %111, %69 : vector<8x128xf32>
    %130 = arith.addf %128, %129 : vector<8x128xf32>
    %131 = arith.index_cast %c1_i32 : i32 to index
    %c0_49 = arith.constant 0 : index
    %c0_50 = arith.constant 0 : index
    %132 = vector.load %arg11[%131, %c0_49, %c0_50] : memref<8x8x128xf32, #tpu.memory_space<vmem>>, vector<1x8x128xf32>
    %133 = vector.shape_cast %132 : vector<1x8x128xf32> to vector<8x128xf32>
    %134 = vector.shape_cast %130 : vector<8x128xf32> to vector<1x8x128xf32>
    tpu.vector_store %arg11[%131, %c0_49, %c0_50], %134 {strides = array<i32>} : memref<8x8x128xf32, #tpu.memory_space<vmem>>, vector<1x8x128xf32>,
    %135 = arith.index_cast %78 : i32 to index
    %c0_51 = arith.constant 0 : index
    %c0_52 = arith.constant 0 : index
    %136 = vector.load %arg12[%135, %c0_51, %c0_52] : memref<8x8x128xf32, #tpu.memory_space<vmem>>, vector<1x8x128xf32>
    %137 = vector.shape_cast %136 : vector<1x8x128xf32> to vector<8x128xf32>
    %138 = vector.shape_cast %130 : vector<8x128xf32> to vector<1x8x128xf32>
    tpu.vector_store %arg12[%135, %c0_51, %c0_52], %138 {strides = array<i32>} : memref<8x8x128xf32, #tpu.memory_space<vmem>>, vector<1x8x128xf32>,
    %c2_i32 = arith.constant 2 : i32
    %c7_i32_53 = arith.constant 7 : i32
    %139 = arith.subi %c7_i32_53, %c2_i32 : i32
    %cst_54 = arith.constant dense<0.000000e+00> : vector<8x384xf32>
    %140 = tpu.matmul %130, %9, %cst_54 {dimension_numbers = #tpu.dot_dimension_numbers<[1], [0], [0], [1], [0, 0, 1, 1], [], []>} : vector<8x128xf32>, vector<128x384xf32>, vector<8x384xf32> -> vector<8x384xf32>
    %141 = arith.index_cast %c2_i32 : i32 to index
    %c0_55 = arith.constant 0 : index
    %c0_56 = arith.constant 0 : index
    %142 = vector.load %arg10[%141, %c0_55, %c0_56] : memref<8x8x384xf32, #tpu.memory_space<vmem>>, vector<1x8x128xf32>
    %143 = vector.shape_cast %142 : vector<1x8x128xf32> to vector<8x128xf32>
    %144 = arith.index_cast %139 : i32 to index
    %c0_57 = arith.constant 0 : index
    %c0_58 = arith.constant 0 : index
    %145 = vector.load %arg10[%144, %c0_57, %c0_58] : memref<8x8x384xf32, #tpu.memory_space<vmem>>, vector<1x8x128xf32>
    %146 = vector.shape_cast %145 : vector<1x8x128xf32> to vector<8x128xf32>
    %147 = vector.shape_cast %15 : vector<1x128xi1> to vector<1x128xi1>
    %148 = vector.broadcast %147 : vector<1x128xi1> to vector<8x128xi1>
    %149 = arith.select %148, %143, %146 : vector<8x128xi1>, vector<8x128xf32>
    %150 = vector.extract_strided_slice %140 {offsets = [0, 0], sizes = [8, 128], strides = [1, 1]} : vector<8x384xf32> to vector<8x128xf32>
    %151 = arith.addf %149, %150 : vector<8x128xf32>
    %152 = arith.negf %151 : vector<8x128xf32>
    %153 = math.exp %152 : vector<8x128xf32>
    %cst_59 = arith.constant 1.000000e+00 : f32
    %154 = vector.broadcast %cst_59 : f32 to vector<8x128xf32>
    %155 = arith.addf %154, %153 : vector<8x128xf32>
    %156 = arith.divf %154, %155 : vector<8x128xf32>
    %157 = arith.index_cast %c2_i32 : i32 to index
    %c0_60 = arith.constant 0 : index
    %c128_61 = arith.constant 128 : index
    %158 = vector.load %arg10[%157, %c0_60, %c128_61] : memref<8x8x384xf32, #tpu.memory_space<vmem>>, vector<1x8x128xf32>
    %159 = vector.shape_cast %158 : vector<1x8x128xf32> to vector<8x128xf32>
    %160 = arith.index_cast %139 : i32 to index
    %c0_62 = arith.constant 0 : index
    %c128_63 = arith.constant 128 : index
    %161 = vector.load %arg10[%160, %c0_62, %c128_63] : memref<8x8x384xf32, #tpu.memory_space<vmem>>, vector<1x8x128xf32>
    %162 = vector.shape_cast %161 : vector<1x8x128xf32> to vector<8x128xf32>
    %163 = vector.shape_cast %15 : vector<1x128xi1> to vector<1x128xi1>
    %164 = vector.broadcast %163 : vector<1x128xi1> to vector<8x128xi1>
    %165 = arith.select %164, %159, %162 : vector<8x128xi1>, vector<8x128xf32>
    %166 = vector.extract_strided_slice %140 {offsets = [0, 128], sizes = [8, 128], strides = [1, 1]} : vector<8x384xf32> to vector<8x128xf32>
    %167 = arith.addf %165, %166 : vector<8x128xf32>
    %168 = arith.negf %167 : vector<8x128xf32>
    %169 = math.exp %168 : vector<8x128xf32>
    %cst_64 = arith.constant 1.000000e+00 : f32
    %170 = vector.broadcast %cst_64 : f32 to vector<8x128xf32>
    %171 = arith.addf %170, %169 : vector<8x128xf32>
    %172 = arith.divf %170, %171 : vector<8x128xf32>
    %173 = arith.index_cast %c2_i32 : i32 to index
    %c0_65 = arith.constant 0 : index
    %c256_66 = arith.constant 256 : index
    %174 = vector.load %arg10[%173, %c0_65, %c256_66] : memref<8x8x384xf32, #tpu.memory_space<vmem>>, vector<1x8x128xf32>
    %175 = vector.shape_cast %174 : vector<1x8x128xf32> to vector<8x128xf32>
    %176 = arith.index_cast %139 : i32 to index
    %c0_67 = arith.constant 0 : index
    %c256_68 = arith.constant 256 : index
    %177 = vector.load %arg10[%176, %c0_67, %c256_68] : memref<8x8x384xf32, #tpu.memory_space<vmem>>, vector<1x8x128xf32>
    %178 = vector.shape_cast %177 : vector<1x8x128xf32> to vector<8x128xf32>
    %179 = vector.shape_cast %15 : vector<1x128xi1> to vector<1x128xi1>
    %180 = vector.broadcast %179 : vector<1x128xi1> to vector<8x128xi1>
    %181 = arith.select %180, %175, %178 : vector<8x128xi1>, vector<8x128xf32>
    %182 = vector.extract_strided_slice %140 {offsets = [0, 256], sizes = [8, 128], strides = [1, 1]} : vector<8x384xf32> to vector<8x128xf32>
    %183 = arith.addf %182, %12 : vector<8x128xf32>
    %184 = arith.mulf %156, %183 : vector<8x128xf32>
    %185 = arith.addf %181, %184 : vector<8x128xf32>
    %186 = math.tanh %185 : vector<8x128xf32>
    %cst_69 = arith.constant 1.000000e+00 : f32
    %187 = vector.broadcast %cst_69 : f32 to vector<8x128xf32>
    %188 = arith.subf %187, %172 : vector<8x128xf32>
    %189 = arith.mulf %188, %186 : vector<8x128xf32>
    %190 = arith.mulf %172, %130 : vector<8x128xf32>
    %191 = arith.addf %189, %190 : vector<8x128xf32>
    %192 = arith.index_cast %c2_i32 : i32 to index
    %c0_70 = arith.constant 0 : index
    %c0_71 = arith.constant 0 : index
    %193 = vector.load %arg11[%192, %c0_70, %c0_71] : memref<8x8x128xf32, #tpu.memory_space<vmem>>, vector<1x8x128xf32>
    %194 = vector.shape_cast %193 : vector<1x8x128xf32> to vector<8x128xf32>
    %195 = vector.shape_cast %191 : vector<8x128xf32> to vector<1x8x128xf32>
    tpu.vector_store %arg11[%192, %c0_70, %c0_71], %195 {strides = array<i32>} : memref<8x8x128xf32, #tpu.memory_space<vmem>>, vector<1x8x128xf32>,
    %196 = arith.index_cast %139 : i32 to index
    %c0_72 = arith.constant 0 : index
    %c0_73 = arith.constant 0 : index
    %197 = vector.load %arg12[%196, %c0_72, %c0_73] : memref<8x8x128xf32, #tpu.memory_space<vmem>>, vector<1x8x128xf32>
    %198 = vector.shape_cast %197 : vector<1x8x128xf32> to vector<8x128xf32>
    %199 = vector.shape_cast %191 : vector<8x128xf32> to vector<1x8x128xf32>
    tpu.vector_store %arg12[%196, %c0_72, %c0_73], %199 {strides = array<i32>} : memref<8x8x128xf32, #tpu.memory_space<vmem>>, vector<1x8x128xf32>,
    %c3_i32 = arith.constant 3 : i32
    %c7_i32_74 = arith.constant 7 : i32
    %200 = arith.subi %c7_i32_74, %c3_i32 : i32
    %cst_75 = arith.constant dense<0.000000e+00> : vector<8x384xf32>
    %201 = tpu.matmul %191, %9, %cst_75 {dimension_numbers = #tpu.dot_dimension_numbers<[1], [0], [0], [1], [0, 0, 1, 1], [], []>} : vector<8x128xf32>, vector<128x384xf32>, vector<8x384xf32> -> vector<8x384xf32>
    %202 = arith.index_cast %c3_i32 : i32 to index
    %c0_76 = arith.constant 0 : index
    %c0_77 = arith.constant 0 : index
    %203 = vector.load %arg10[%202, %c0_76, %c0_77] : memref<8x8x384xf32, #tpu.memory_space<vmem>>, vector<1x8x128xf32>
    %204 = vector.shape_cast %203 : vector<1x8x128xf32> to vector<8x128xf32>
    %205 = arith.index_cast %200 : i32 to index
    %c0_78 = arith.constant 0 : index
    %c0_79 = arith.constant 0 : index
    %206 = vector.load %arg10[%205, %c0_78, %c0_79] : memref<8x8x384xf32, #tpu.memory_space<vmem>>, vector<1x8x128xf32>
    %207 = vector.shape_cast %206 : vector<1x8x128xf32> to vector<8x128xf32>
    %208 = vector.shape_cast %15 : vector<1x128xi1> to vector<1x128xi1>
    %209 = vector.broadcast %208 : vector<1x128xi1> to vector<8x128xi1>
    %210 = arith.select %209, %204, %207 : vector<8x128xi1>, vector<8x128xf32>
    %211 = vector.extract_strided_slice %201 {offsets = [0, 0], sizes = [8, 128], strides = [1, 1]} : vector<8x384xf32> to vector<8x128xf32>
    %212 = arith.addf %210, %211 : vector<8x128xf32>
    %213 = arith.negf %212 : vector<8x128xf32>
    %214 = math.exp %213 : vector<8x128xf32>
    %cst_80 = arith.constant 1.000000e+00 : f32
    %215 = vector.broadcast %cst_80 : f32 to vector<8x128xf32>
    %216 = arith.addf %215, %214 : vector<8x128xf32>
    %217 = arith.divf %215, %216 : vector<8x128xf32>
    %218 = arith.index_cast %c3_i32 : i32 to index
    %c0_81 = arith.constant 0 : index
    %c128_82 = arith.constant 128 : index
    %219 = vector.load %arg10[%218, %c0_81, %c128_82] : memref<8x8x384xf32, #tpu.memory_space<vmem>>, vector<1x8x128xf32>
    %220 = vector.shape_cast %219 : vector<1x8x128xf32> to vector<8x128xf32>
    %221 = arith.index_cast %200 : i32 to index
    %c0_83 = arith.constant 0 : index
    %c128_84 = arith.constant 128 : index
    %222 = vector.load %arg10[%221, %c0_83, %c128_84] : memref<8x8x384xf32, #tpu.memory_space<vmem>>, vector<1x8x128xf32>
    %223 = vector.shape_cast %222 : vector<1x8x128xf32> to vector<8x128xf32>
    %224 = vector.shape_cast %15 : vector<1x128xi1> to vector<1x128xi1>
    %225 = vector.broadcast %224 : vector<1x128xi1> to vector<8x128xi1>
    %226 = arith.select %225, %220, %223 : vector<8x128xi1>, vector<8x128xf32>
    %227 = vector.extract_strided_slice %201 {offsets = [0, 128], sizes = [8, 128], strides = [1, 1]} : vector<8x384xf32> to vector<8x128xf32>
    %228 = arith.addf %226, %227 : vector<8x128xf32>
    %229 = arith.negf %228 : vector<8x128xf32>
    %230 = math.exp %229 : vector<8x128xf32>
    %cst_85 = arith.constant 1.000000e+00 : f32
    %231 = vector.broadcast %cst_85 : f32 to vector<8x128xf32>
    %232 = arith.addf %231, %230 : vector<8x128xf32>
    %233 = arith.divf %231, %232 : vector<8x128xf32>
    %234 = arith.index_cast %c3_i32 : i32 to index
    %c0_86 = arith.constant 0 : index
    %c256_87 = arith.constant 256 : index
    %235 = vector.load %arg10[%234, %c0_86, %c256_87] : memref<8x8x384xf32, #tpu.memory_space<vmem>>, vector<1x8x128xf32>
    %236 = vector.shape_cast %235 : vector<1x8x128xf32> to vector<8x128xf32>
    %237 = arith.index_cast %200 : i32 to index
    %c0_88 = arith.constant 0 : index
    %c256_89 = arith.constant 256 : index
    %238 = vector.load %arg10[%237, %c0_88, %c256_89] : memref<8x8x384xf32, #tpu.memory_space<vmem>>, vector<1x8x128xf32>
    %239 = vector.shape_cast %238 : vector<1x8x128xf32> to vector<8x128xf32>
    %240 = vector.shape_cast %15 : vector<1x128xi1> to vector<1x128xi1>
    %241 = vector.broadcast %240 : vector<1x128xi1> to vector<8x128xi1>
    %242 = arith.select %241, %236, %239 : vector<8x128xi1>, vector<8x128xf32>
    %243 = vector.extract_strided_slice %201 {offsets = [0, 256], sizes = [8, 128], strides = [1, 1]} : vector<8x384xf32> to vector<8x128xf32>
    %244 = arith.addf %243, %12 : vector<8x128xf32>
    %245 = arith.mulf %217, %244 : vector<8x128xf32>
    %246 = arith.addf %242, %245 : vector<8x128xf32>
    %247 = math.tanh %246 : vector<8x128xf32>
    %cst_90 = arith.constant 1.000000e+00 : f32
    %248 = vector.broadcast %cst_90 : f32 to vector<8x128xf32>
    %249 = arith.subf %248, %233 : vector<8x128xf32>
    %250 = arith.mulf %249, %247 : vector<8x128xf32>
    %251 = arith.mulf %233, %191 : vector<8x128xf32>
    %252 = arith.addf %250, %251 : vector<8x128xf32>
    %253 = arith.index_cast %c3_i32 : i32 to index
    %c0_91 = arith.constant 0 : index
    %c0_92 = arith.constant 0 : index
    %254 = vector.load %arg11[%253, %c0_91, %c0_92] : memref<8x8x128xf32, #tpu.memory_space<vmem>>, vector<1x8x128xf32>
    %255 = vector.shape_cast %254 : vector<1x8x128xf32> to vector<8x128xf32>
    %256 = vector.shape_cast %252 : vector<8x128xf32> to vector<1x8x128xf32>
    tpu.vector_store %arg11[%253, %c0_91, %c0_92], %256 {strides = array<i32>} : memref<8x8x128xf32, #tpu.memory_space<vmem>>, vector<1x8x128xf32>,
    %257 = arith.index_cast %200 : i32 to index
    %c0_93 = arith.constant 0 : index
    %c0_94 = arith.constant 0 : index
    %258 = vector.load %arg12[%257, %c0_93, %c0_94] : memref<8x8x128xf32, #tpu.memory_space<vmem>>, vector<1x8x128xf32>
    %259 = vector.shape_cast %258 : vector<1x8x128xf32> to vector<8x128xf32>
    %260 = vector.shape_cast %252 : vector<8x128xf32> to vector<1x8x128xf32>
    tpu.vector_store %arg12[%257, %c0_93, %c0_94], %260 {strides = array<i32>} : memref<8x8x128xf32, #tpu.memory_space<vmem>>, vector<1x8x128xf32>,
    %c4_i32 = arith.constant 4 : i32
    %c7_i32_95 = arith.constant 7 : i32
    %261 = arith.subi %c7_i32_95, %c4_i32 : i32
    %cst_96 = arith.constant dense<0.000000e+00> : vector<8x384xf32>
    %262 = tpu.matmul %252, %9, %cst_96 {dimension_numbers = #tpu.dot_dimension_numbers<[1], [0], [0], [1], [0, 0, 1, 1], [], []>} : vector<8x128xf32>, vector<128x384xf32>, vector<8x384xf32> -> vector<8x384xf32>
    %263 = arith.index_cast %c4_i32 : i32 to index
    %c0_97 = arith.constant 0 : index
    %c0_98 = arith.constant 0 : index
    %264 = vector.load %arg10[%263, %c0_97, %c0_98] : memref<8x8x384xf32, #tpu.memory_space<vmem>>, vector<1x8x128xf32>
    %265 = vector.shape_cast %264 : vector<1x8x128xf32> to vector<8x128xf32>
    %266 = arith.index_cast %261 : i32 to index
    %c0_99 = arith.constant 0 : index
    %c0_100 = arith.constant 0 : index
    %267 = vector.load %arg10[%266, %c0_99, %c0_100] : memref<8x8x384xf32, #tpu.memory_space<vmem>>, vector<1x8x128xf32>
    %268 = vector.shape_cast %267 : vector<1x8x128xf32> to vector<8x128xf32>
    %269 = vector.shape_cast %15 : vector<1x128xi1> to vector<1x128xi1>
    %270 = vector.broadcast %269 : vector<1x128xi1> to vector<8x128xi1>
    %271 = arith.select %270, %265, %268 : vector<8x128xi1>, vector<8x128xf32>
    %272 = vector.extract_strided_slice %262 {offsets = [0, 0], sizes = [8, 128], strides = [1, 1]} : vector<8x384xf32> to vector<8x128xf32>
    %273 = arith.addf %271, %272 : vector<8x128xf32>
    %274 = arith.negf %273 : vector<8x128xf32>
    %275 = math.exp %274 : vector<8x128xf32>
    %cst_101 = arith.constant 1.000000e+00 : f32
    %276 = vector.broadcast %cst_101 : f32 to vector<8x128xf32>
    %277 = arith.addf %276, %275 : vector<8x128xf32>
    %278 = arith.divf %276, %277 : vector<8x128xf32>
    %279 = arith.index_cast %c4_i32 : i32 to index
    %c0_102 = arith.constant 0 : index
    %c128_103 = arith.constant 128 : index
    %280 = vector.load %arg10[%279, %c0_102, %c128_103] : memref<8x8x384xf32, #tpu.memory_space<vmem>>, vector<1x8x128xf32>
    %281 = vector.shape_cast %280 : vector<1x8x128xf32> to vector<8x128xf32>
    %282 = arith.index_cast %261 : i32 to index
    %c0_104 = arith.constant 0 : index
    %c128_105 = arith.constant 128 : index
    %283 = vector.load %arg10[%282, %c0_104, %c128_105] : memref<8x8x384xf32, #tpu.memory_space<vmem>>, vector<1x8x128xf32>
    %284 = vector.shape_cast %283 : vector<1x8x128xf32> to vector<8x128xf32>
    %285 = vector.shape_cast %15 : vector<1x128xi1> to vector<1x128xi1>
    %286 = vector.broadcast %285 : vector<1x128xi1> to vector<8x128xi1>
    %287 = arith.select %286, %281, %284 : vector<8x128xi1>, vector<8x128xf32>
    %288 = vector.extract_strided_slice %262 {offsets = [0, 128], sizes = [8, 128], strides = [1, 1]} : vector<8x384xf32> to vector<8x128xf32>
    %289 = arith.addf %287, %288 : vector<8x128xf32>
    %290 = arith.negf %289 : vector<8x128xf32>
    %291 = math.exp %290 : vector<8x128xf32>
    %cst_106 = arith.constant 1.000000e+00 : f32
    %292 = vector.broadcast %cst_106 : f32 to vector<8x128xf32>
    %293 = arith.addf %292, %291 : vector<8x128xf32>
    %294 = arith.divf %292, %293 : vector<8x128xf32>
    %295 = arith.index_cast %c4_i32 : i32 to index
    %c0_107 = arith.constant 0 : index
    %c256_108 = arith.constant 256 : index
    %296 = vector.load %arg10[%295, %c0_107, %c256_108] : memref<8x8x384xf32, #tpu.memory_space<vmem>>, vector<1x8x128xf32>
    %297 = vector.shape_cast %296 : vector<1x8x128xf32> to vector<8x128xf32>
    %298 = arith.index_cast %261 : i32 to index
    %c0_109 = arith.constant 0 : index
    %c256_110 = arith.constant 256 : index
    %299 = vector.load %arg10[%298, %c0_109, %c256_110] : memref<8x8x384xf32, #tpu.memory_space<vmem>>, vector<1x8x128xf32>
    %300 = vector.shape_cast %299 : vector<1x8x128xf32> to vector<8x128xf32>
    %301 = vector.shape_cast %15 : vector<1x128xi1> to vector<1x128xi1>
    %302 = vector.broadcast %301 : vector<1x128xi1> to vector<8x128xi1>
    %303 = arith.select %302, %297, %300 : vector<8x128xi1>, vector<8x128xf32>
    %304 = vector.extract_strided_slice %262 {offsets = [0, 256], sizes = [8, 128], strides = [1, 1]} : vector<8x384xf32> to vector<8x128xf32>
    %305 = arith.addf %304, %12 : vector<8x128xf32>
    %306 = arith.mulf %278, %305 : vector<8x128xf32>
    %307 = arith.addf %303, %306 : vector<8x128xf32>
    %308 = math.tanh %307 : vector<8x128xf32>
    %cst_111 = arith.constant 1.000000e+00 : f32
    %309 = vector.broadcast %cst_111 : f32 to vector<8x128xf32>
    %310 = arith.subf %309, %294 : vector<8x128xf32>
    %311 = arith.mulf %310, %308 : vector<8x128xf32>
    %312 = arith.mulf %294, %252 : vector<8x128xf32>
    %313 = arith.addf %311, %312 : vector<8x128xf32>
    %314 = arith.index_cast %c4_i32 : i32 to index
    %c0_112 = arith.constant 0 : index
    %c0_113 = arith.constant 0 : index
    %315 = vector.load %arg11[%314, %c0_112, %c0_113] : memref<8x8x128xf32, #tpu.memory_space<vmem>>, vector<1x8x128xf32>
    %316 = vector.shape_cast %315 : vector<1x8x128xf32> to vector<8x128xf32>
    %317 = vector.shape_cast %313 : vector<8x128xf32> to vector<1x8x128xf32>
    tpu.vector_store %arg11[%314, %c0_112, %c0_113], %317 {strides = array<i32>} : memref<8x8x128xf32, #tpu.memory_space<vmem>>, vector<1x8x128xf32>,
    %318 = arith.index_cast %261 : i32 to index
    %c0_114 = arith.constant 0 : index
    %c0_115 = arith.constant 0 : index
    %319 = vector.load %arg12[%318, %c0_114, %c0_115] : memref<8x8x128xf32, #tpu.memory_space<vmem>>, vector<1x8x128xf32>
    %320 = vector.shape_cast %319 : vector<1x8x128xf32> to vector<8x128xf32>
    %321 = vector.shape_cast %313 : vector<8x128xf32> to vector<1x8x128xf32>
    tpu.vector_store %arg12[%318, %c0_114, %c0_115], %321 {strides = array<i32>} : memref<8x8x128xf32, #tpu.memory_space<vmem>>, vector<1x8x128xf32>,
    %c5_i32 = arith.constant 5 : i32
    %c7_i32_116 = arith.constant 7 : i32
    %322 = arith.subi %c7_i32_116, %c5_i32 : i32
    %cst_117 = arith.constant dense<0.000000e+00> : vector<8x384xf32>
    %323 = tpu.matmul %313, %9, %cst_117 {dimension_numbers = #tpu.dot_dimension_numbers<[1], [0], [0], [1], [0, 0, 1, 1], [], []>} : vector<8x128xf32>, vector<128x384xf32>, vector<8x384xf32> -> vector<8x384xf32>
    %324 = arith.index_cast %c5_i32 : i32 to index
    %c0_118 = arith.constant 0 : index
    %c0_119 = arith.constant 0 : index
    %325 = vector.load %arg10[%324, %c0_118, %c0_119] : memref<8x8x384xf32, #tpu.memory_space<vmem>>, vector<1x8x128xf32>
    %326 = vector.shape_cast %325 : vector<1x8x128xf32> to vector<8x128xf32>
    %327 = arith.index_cast %322 : i32 to index
    %c0_120 = arith.constant 0 : index
    %c0_121 = arith.constant 0 : index
    %328 = vector.load %arg10[%327, %c0_120, %c0_121] : memref<8x8x384xf32, #tpu.memory_space<vmem>>, vector<1x8x128xf32>
    %329 = vector.shape_cast %328 : vector<1x8x128xf32> to vector<8x128xf32>
    %330 = vector.shape_cast %15 : vector<1x128xi1> to vector<1x128xi1>
    %331 = vector.broadcast %330 : vector<1x128xi1> to vector<8x128xi1>
    %332 = arith.select %331, %326, %329 : vector<8x128xi1>, vector<8x128xf32>
    %333 = vector.extract_strided_slice %323 {offsets = [0, 0], sizes = [8, 128], strides = [1, 1]} : vector<8x384xf32> to vector<8x128xf32>
    %334 = arith.addf %332, %333 : vector<8x128xf32>
    %335 = arith.negf %334 : vector<8x128xf32>
    %336 = math.exp %335 : vector<8x128xf32>
    %cst_122 = arith.constant 1.000000e+00 : f32
    %337 = vector.broadcast %cst_122 : f32 to vector<8x128xf32>
    %338 = arith.addf %337, %336 : vector<8x128xf32>
    %339 = arith.divf %337, %338 : vector<8x128xf32>
    %340 = arith.index_cast %c5_i32 : i32 to index
    %c0_123 = arith.constant 0 : index
    %c128_124 = arith.constant 128 : index
    %341 = vector.load %arg10[%340, %c0_123, %c128_124] : memref<8x8x384xf32, #tpu.memory_space<vmem>>, vector<1x8x128xf32>
    %342 = vector.shape_cast %341 : vector<1x8x128xf32> to vector<8x128xf32>
    %343 = arith.index_cast %322 : i32 to index
    %c0_125 = arith.constant 0 : index
    %c128_126 = arith.constant 128 : index
    %344 = vector.load %arg10[%343, %c0_125, %c128_126] : memref<8x8x384xf32, #tpu.memory_space<vmem>>, vector<1x8x128xf32>
    %345 = vector.shape_cast %344 : vector<1x8x128xf32> to vector<8x128xf32>
    %346 = vector.shape_cast %15 : vector<1x128xi1> to vector<1x128xi1>
    %347 = vector.broadcast %346 : vector<1x128xi1> to vector<8x128xi1>
    %348 = arith.select %347, %342, %345 : vector<8x128xi1>, vector<8x128xf32>
    %349 = vector.extract_strided_slice %323 {offsets = [0, 128], sizes = [8, 128], strides = [1, 1]} : vector<8x384xf32> to vector<8x128xf32>
    %350 = arith.addf %348, %349 : vector<8x128xf32>
    %351 = arith.negf %350 : vector<8x128xf32>
    %352 = math.exp %351 : vector<8x128xf32>
    %cst_127 = arith.constant 1.000000e+00 : f32
    %353 = vector.broadcast %cst_127 : f32 to vector<8x128xf32>
    %354 = arith.addf %353, %352 : vector<8x128xf32>
    %355 = arith.divf %353, %354 : vector<8x128xf32>
    %356 = arith.index_cast %c5_i32 : i32 to index
    %c0_128 = arith.constant 0 : index
    %c256_129 = arith.constant 256 : index
    %357 = vector.load %arg10[%356, %c0_128, %c256_129] : memref<8x8x384xf32, #tpu.memory_space<vmem>>, vector<1x8x128xf32>
    %358 = vector.shape_cast %357 : vector<1x8x128xf32> to vector<8x128xf32>
    %359 = arith.index_cast %322 : i32 to index
    %c0_130 = arith.constant 0 : index
    %c256_131 = arith.constant 256 : index
    %360 = vector.load %arg10[%359, %c0_130, %c256_131] : memref<8x8x384xf32, #tpu.memory_space<vmem>>, vector<1x8x128xf32>
    %361 = vector.shape_cast %360 : vector<1x8x128xf32> to vector<8x128xf32>
    %362 = vector.shape_cast %15 : vector<1x128xi1> to vector<1x128xi1>
    %363 = vector.broadcast %362 : vector<1x128xi1> to vector<8x128xi1>
    %364 = arith.select %363, %358, %361 : vector<8x128xi1>, vector<8x128xf32>
    %365 = vector.extract_strided_slice %323 {offsets = [0, 256], sizes = [8, 128], strides = [1, 1]} : vector<8x384xf32> to vector<8x128xf32>
    %366 = arith.addf %365, %12 : vector<8x128xf32>
    %367 = arith.mulf %339, %366 : vector<8x128xf32>
    %368 = arith.addf %364, %367 : vector<8x128xf32>
    %369 = math.tanh %368 : vector<8x128xf32>
    %cst_132 = arith.constant 1.000000e+00 : f32
    %370 = vector.broadcast %cst_132 : f32 to vector<8x128xf32>
    %371 = arith.subf %370, %355 : vector<8x128xf32>
    %372 = arith.mulf %371, %369 : vector<8x128xf32>
    %373 = arith.mulf %355, %313 : vector<8x128xf32>
    %374 = arith.addf %372, %373 : vector<8x128xf32>
    %375 = arith.index_cast %c5_i32 : i32 to index
    %c0_133 = arith.constant 0 : index
    %c0_134 = arith.constant 0 : index
    %376 = vector.load %arg11[%375, %c0_133, %c0_134] : memref<8x8x128xf32, #tpu.memory_space<vmem>>, vector<1x8x128xf32>
    %377 = vector.shape_cast %376 : vector<1x8x128xf32> to vector<8x128xf32>
    %378 = vector.shape_cast %374 : vector<8x128xf32> to vector<1x8x128xf32>
    tpu.vector_store %arg11[%375, %c0_133, %c0_134], %378 {strides = array<i32>} : memref<8x8x128xf32, #tpu.memory_space<vmem>>, vector<1x8x128xf32>,
    %379 = arith.index_cast %322 : i32 to index
    %c0_135 = arith.constant 0 : index
    %c0_136 = arith.constant 0 : index
    %380 = vector.load %arg12[%379, %c0_135, %c0_136] : memref<8x8x128xf32, #tpu.memory_space<vmem>>, vector<1x8x128xf32>
    %381 = vector.shape_cast %380 : vector<1x8x128xf32> to vector<8x128xf32>
    %382 = vector.shape_cast %374 : vector<8x128xf32> to vector<1x8x128xf32>
    tpu.vector_store %arg12[%379, %c0_135, %c0_136], %382 {strides = array<i32>} : memref<8x8x128xf32, #tpu.memory_space<vmem>>, vector<1x8x128xf32>,
    %c6_i32 = arith.constant 6 : i32
    %c7_i32_137 = arith.constant 7 : i32
    %383 = arith.subi %c7_i32_137, %c6_i32 : i32
    %cst_138 = arith.constant dense<0.000000e+00> : vector<8x384xf32>
    %384 = tpu.matmul %374, %9, %cst_138 {dimension_numbers = #tpu.dot_dimension_numbers<[1], [0], [0], [1], [0, 0, 1, 1], [], []>} : vector<8x128xf32>, vector<128x384xf32>, vector<8x384xf32> -> vector<8x384xf32>
    %385 = arith.index_cast %c6_i32 : i32 to index
    %c0_139 = arith.constant 0 : index
    %c0_140 = arith.constant 0 : index
    %386 = vector.load %arg10[%385, %c0_139, %c0_140] : memref<8x8x384xf32, #tpu.memory_space<vmem>>, vector<1x8x128xf32>
    %387 = vector.shape_cast %386 : vector<1x8x128xf32> to vector<8x128xf32>
    %388 = arith.index_cast %383 : i32 to index
    %c0_141 = arith.constant 0 : index
    %c0_142 = arith.constant 0 : index
    %389 = vector.load %arg10[%388, %c0_141, %c0_142] : memref<8x8x384xf32, #tpu.memory_space<vmem>>, vector<1x8x128xf32>
    %390 = vector.shape_cast %389 : vector<1x8x128xf32> to vector<8x128xf32>
    %391 = vector.shape_cast %15 : vector<1x128xi1> to vector<1x128xi1>
    %392 = vector.broadcast %391 : vector<1x128xi1> to vector<8x128xi1>
    %393 = arith.select %392, %387, %390 : vector<8x128xi1>, vector<8x128xf32>
    %394 = vector.extract_strided_slice %384 {offsets = [0, 0], sizes = [8, 128], strides = [1, 1]} : vector<8x384xf32> to vector<8x128xf32>
    %395 = arith.addf %393, %394 : vector<8x128xf32>
    %396 = arith.negf %395 : vector<8x128xf32>
    %397 = math.exp %396 : vector<8x128xf32>
    %cst_143 = arith.constant 1.000000e+00 : f32
    %398 = vector.broadcast %cst_143 : f32 to vector<8x128xf32>
    %399 = arith.addf %398, %397 : vector<8x128xf32>
    %400 = arith.divf %398, %399 : vector<8x128xf32>
    %401 = arith.index_cast %c6_i32 : i32 to index
    %c0_144 = arith.constant 0 : index
    %c128_145 = arith.constant 128 : index
    %402 = vector.load %arg10[%401, %c0_144, %c128_145] : memref<8x8x384xf32, #tpu.memory_space<vmem>>, vector<1x8x128xf32>
    %403 = vector.shape_cast %402 : vector<1x8x128xf32> to vector<8x128xf32>
    %404 = arith.index_cast %383 : i32 to index
    %c0_146 = arith.constant 0 : index
    %c128_147 = arith.constant 128 : index
    %405 = vector.load %arg10[%404, %c0_146, %c128_147] : memref<8x8x384xf32, #tpu.memory_space<vmem>>, vector<1x8x128xf32>
    %406 = vector.shape_cast %405 : vector<1x8x128xf32> to vector<8x128xf32>
    %407 = vector.shape_cast %15 : vector<1x128xi1> to vector<1x128xi1>
    %408 = vector.broadcast %407 : vector<1x128xi1> to vector<8x128xi1>
    %409 = arith.select %408, %403, %406 : vector<8x128xi1>, vector<8x128xf32>
    %410 = vector.extract_strided_slice %384 {offsets = [0, 128], sizes = [8, 128], strides = [1, 1]} : vector<8x384xf32> to vector<8x128xf32>
    %411 = arith.addf %409, %410 : vector<8x128xf32>
    %412 = arith.negf %411 : vector<8x128xf32>
    %413 = math.exp %412 : vector<8x128xf32>
    %cst_148 = arith.constant 1.000000e+00 : f32
    %414 = vector.broadcast %cst_148 : f32 to vector<8x128xf32>
    %415 = arith.addf %414, %413 : vector<8x128xf32>
    %416 = arith.divf %414, %415 : vector<8x128xf32>
    %417 = arith.index_cast %c6_i32 : i32 to index
    %c0_149 = arith.constant 0 : index
    %c256_150 = arith.constant 256 : index
    %418 = vector.load %arg10[%417, %c0_149, %c256_150] : memref<8x8x384xf32, #tpu.memory_space<vmem>>, vector<1x8x128xf32>
    %419 = vector.shape_cast %418 : vector<1x8x128xf32> to vector<8x128xf32>
    %420 = arith.index_cast %383 : i32 to index
    %c0_151 = arith.constant 0 : index
    %c256_152 = arith.constant 256 : index
    %421 = vector.load %arg10[%420, %c0_151, %c256_152] : memref<8x8x384xf32, #tpu.memory_space<vmem>>, vector<1x8x128xf32>
    %422 = vector.shape_cast %421 : vector<1x8x128xf32> to vector<8x128xf32>
    %423 = vector.shape_cast %15 : vector<1x128xi1> to vector<1x128xi1>
    %424 = vector.broadcast %423 : vector<1x128xi1> to vector<8x128xi1>
    %425 = arith.select %424, %419, %422 : vector<8x128xi1>, vector<8x128xf32>
    %426 = vector.extract_strided_slice %384 {offsets = [0, 256], sizes = [8, 128], strides = [1, 1]} : vector<8x384xf32> to vector<8x128xf32>
    %427 = arith.addf %426, %12 : vector<8x128xf32>
    %428 = arith.mulf %400, %427 : vector<8x128xf32>
    %429 = arith.addf %425, %428 : vector<8x128xf32>
    %430 = math.tanh %429 : vector<8x128xf32>
    %cst_153 = arith.constant 1.000000e+00 : f32
    %431 = vector.broadcast %cst_153 : f32 to vector<8x128xf32>
    %432 = arith.subf %431, %416 : vector<8x128xf32>
    %433 = arith.mulf %432, %430 : vector<8x128xf32>
    %434 = arith.mulf %416, %374 : vector<8x128xf32>
    %435 = arith.addf %433, %434 : vector<8x128xf32>
    %436 = arith.index_cast %c6_i32 : i32 to index
    %c0_154 = arith.constant 0 : index
    %c0_155 = arith.constant 0 : index
    %437 = vector.load %arg11[%436, %c0_154, %c0_155] : memref<8x8x128xf32, #tpu.memory_space<vmem>>, vector<1x8x128xf32>
    %438 = vector.shape_cast %437 : vector<1x8x128xf32> to vector<8x128xf32>
    %439 = vector.shape_cast %435 : vector<8x128xf32> to vector<1x8x128xf32>
    tpu.vector_store %arg11[%436, %c0_154, %c0_155], %439 {strides = array<i32>} : memref<8x8x128xf32, #tpu.memory_space<vmem>>, vector<1x8x128xf32>,
    %440 = arith.index_cast %383 : i32 to index
    %c0_156 = arith.constant 0 : index
    %c0_157 = arith.constant 0 : index
    %441 = vector.load %arg12[%440, %c0_156, %c0_157] : memref<8x8x128xf32, #tpu.memory_space<vmem>>, vector<1x8x128xf32>
    %442 = vector.shape_cast %441 : vector<1x8x128xf32> to vector<8x128xf32>
    %443 = vector.shape_cast %435 : vector<8x128xf32> to vector<1x8x128xf32>
    tpu.vector_store %arg12[%440, %c0_156, %c0_157], %443 {strides = array<i32>} : memref<8x8x128xf32, #tpu.memory_space<vmem>>, vector<1x8x128xf32>,
    %c7_i32_158 = arith.constant 7 : i32
    %c7_i32_159 = arith.constant 7 : i32
    %444 = arith.subi %c7_i32_159, %c7_i32_158 : i32
    %cst_160 = arith.constant dense<0.000000e+00> : vector<8x384xf32>
    %445 = tpu.matmul %435, %9, %cst_160 {dimension_numbers = #tpu.dot_dimension_numbers<[1], [0], [0], [1], [0, 0, 1, 1], [], []>} : vector<8x128xf32>, vector<128x384xf32>, vector<8x384xf32> -> vector<8x384xf32>
    %446 = arith.index_cast %c7_i32_158 : i32 to index
    %c0_161 = arith.constant 0 : index
    %c0_162 = arith.constant 0 : index
    %447 = vector.load %arg10[%446, %c0_161, %c0_162] : memref<8x8x384xf32, #tpu.memory_space<vmem>>, vector<1x8x128xf32>
    %448 = vector.shape_cast %447 : vector<1x8x128xf32> to vector<8x128xf32>
    %449 = arith.index_cast %444 : i32 to index
    %c0_163 = arith.constant 0 : index
    %c0_164 = arith.constant 0 : index
    %450 = vector.load %arg10[%449, %c0_163, %c0_164] : memref<8x8x384xf32, #tpu.memory_space<vmem>>, vector<1x8x128xf32>
    %451 = vector.shape_cast %450 : vector<1x8x128xf32> to vector<8x128xf32>
    %452 = vector.shape_cast %15 : vector<1x128xi1> to vector<1x128xi1>
    %453 = vector.broadcast %452 : vector<1x128xi1> to vector<8x128xi1>
    %454 = arith.select %453, %448, %451 : vector<8x128xi1>, vector<8x128xf32>
    %455 = vector.extract_strided_slice %445 {offsets = [0, 0], sizes = [8, 128], strides = [1, 1]} : vector<8x384xf32> to vector<8x128xf32>
    %456 = arith.addf %454, %455 : vector<8x128xf32>
    %457 = arith.negf %456 : vector<8x128xf32>
    %458 = math.exp %457 : vector<8x128xf32>
    %cst_165 = arith.constant 1.000000e+00 : f32
    %459 = vector.broadcast %cst_165 : f32 to vector<8x128xf32>
    %460 = arith.addf %459, %458 : vector<8x128xf32>
    %461 = arith.divf %459, %460 : vector<8x128xf32>
    %462 = arith.index_cast %c7_i32_158 : i32 to index
    %c0_166 = arith.constant 0 : index
    %c128_167 = arith.constant 128 : index
    %463 = vector.load %arg10[%462, %c0_166, %c128_167] : memref<8x8x384xf32, #tpu.memory_space<vmem>>, vector<1x8x128xf32>
    %464 = vector.shape_cast %463 : vector<1x8x128xf32> to vector<8x128xf32>
    %465 = arith.index_cast %444 : i32 to index
    %c0_168 = arith.constant 0 : index
    %c128_169 = arith.constant 128 : index
    %466 = vector.load %arg10[%465, %c0_168, %c128_169] : memref<8x8x384xf32, #tpu.memory_space<vmem>>, vector<1x8x128xf32>
    %467 = vector.shape_cast %466 : vector<1x8x128xf32> to vector<8x128xf32>
    %468 = vector.shape_cast %15 : vector<1x128xi1> to vector<1x128xi1>
    %469 = vector.broadcast %468 : vector<1x128xi1> to vector<8x128xi1>
    %470 = arith.select %469, %464, %467 : vector<8x128xi1>, vector<8x128xf32>
    %471 = vector.extract_strided_slice %445 {offsets = [0, 128], sizes = [8, 128], strides = [1, 1]} : vector<8x384xf32> to vector<8x128xf32>
    %472 = arith.addf %470, %471 : vector<8x128xf32>
    %473 = arith.negf %472 : vector<8x128xf32>
    %474 = math.exp %473 : vector<8x128xf32>
    %cst_170 = arith.constant 1.000000e+00 : f32
    %475 = vector.broadcast %cst_170 : f32 to vector<8x128xf32>
    %476 = arith.addf %475, %474 : vector<8x128xf32>
    %477 = arith.divf %475, %476 : vector<8x128xf32>
    %478 = arith.index_cast %c7_i32_158 : i32 to index
    %c0_171 = arith.constant 0 : index
    %c256_172 = arith.constant 256 : index
    %479 = vector.load %arg10[%478, %c0_171, %c256_172] : memref<8x8x384xf32, #tpu.memory_space<vmem>>, vector<1x8x128xf32>
    %480 = vector.shape_cast %479 : vector<1x8x128xf32> to vector<8x128xf32>
    %481 = arith.index_cast %444 : i32 to index
    %c0_173 = arith.constant 0 : index
    %c256_174 = arith.constant 256 : index
    %482 = vector.load %arg10[%481, %c0_173, %c256_174] : memref<8x8x384xf32, #tpu.memory_space<vmem>>, vector<1x8x128xf32>
    %483 = vector.shape_cast %482 : vector<1x8x128xf32> to vector<8x128xf32>
    %484 = vector.shape_cast %15 : vector<1x128xi1> to vector<1x128xi1>
    %485 = vector.broadcast %484 : vector<1x128xi1> to vector<8x128xi1>
    %486 = arith.select %485, %480, %483 : vector<8x128xi1>, vector<8x128xf32>
    %487 = vector.extract_strided_slice %445 {offsets = [0, 256], sizes = [8, 128], strides = [1, 1]} : vector<8x384xf32> to vector<8x128xf32>
    %488 = arith.addf %487, %12 : vector<8x128xf32>
    %489 = arith.mulf %461, %488 : vector<8x128xf32>
    %490 = arith.addf %486, %489 : vector<8x128xf32>
    %491 = math.tanh %490 : vector<8x128xf32>
    %cst_175 = arith.constant 1.000000e+00 : f32
    %492 = vector.broadcast %cst_175 : f32 to vector<8x128xf32>
    %493 = arith.subf %492, %477 : vector<8x128xf32>
    %494 = arith.mulf %493, %491 : vector<8x128xf32>
    %495 = arith.mulf %477, %435 : vector<8x128xf32>
    %496 = arith.addf %494, %495 : vector<8x128xf32>
    %497 = arith.index_cast %c7_i32_158 : i32 to index
    %c0_176 = arith.constant 0 : index
    %c0_177 = arith.constant 0 : index
    %498 = vector.load %arg11[%497, %c0_176, %c0_177] : memref<8x8x128xf32, #tpu.memory_space<vmem>>, vector<1x8x128xf32>
    %499 = vector.shape_cast %498 : vector<1x8x128xf32> to vector<8x128xf32>
    %500 = vector.shape_cast %496 : vector<8x128xf32> to vector<1x8x128xf32>
    tpu.vector_store %arg11[%497, %c0_176, %c0_177], %500 {strides = array<i32>} : memref<8x8x128xf32, #tpu.memory_space<vmem>>, vector<1x8x128xf32>,
    %501 = arith.index_cast %444 : i32 to index
    %c0_178 = arith.constant 0 : index
    %c0_179 = arith.constant 0 : index
    %502 = vector.load %arg12[%501, %c0_178, %c0_179] : memref<8x8x128xf32, #tpu.memory_space<vmem>>, vector<1x8x128xf32>
    %503 = vector.shape_cast %502 : vector<1x8x128xf32> to vector<8x128xf32>
    %504 = vector.shape_cast %496 : vector<8x128xf32> to vector<1x8x128xf32>
    tpu.vector_store %arg12[%501, %c0_178, %c0_179], %504 {strides = array<i32>} : memref<8x8x128xf32, #tpu.memory_space<vmem>>, vector<1x8x128xf32>,
    %c8_i32 = arith.constant 8 : i32
    %c0_180 = arith.constant 0 : index
    %c0_181 = arith.constant 0 : index
    %c0_182 = arith.constant 0 : index
    %505 = vector.load %arg11[%c0_180, %c0_181, %c0_182] : memref<8x8x128xf32, #tpu.memory_space<vmem>>, vector<8x8x128xf32>
    %506 = vector.shape_cast %505 : vector<8x8x128xf32> to vector<64x128xf32>
    %c0_183 = arith.constant 0 : index
    %c0_184 = arith.constant 0 : index
    %c0_185 = arith.constant 0 : index
    %507 = vector.load %arg12[%c0_183, %c0_184, %c0_185] : memref<8x8x128xf32, #tpu.memory_space<vmem>>, vector<8x8x128xf32>
    %508 = vector.shape_cast %507 : vector<8x8x128xf32> to vector<64x128xf32>
    %c0_186 = arith.constant 0 : index
    %c0_187 = arith.constant 0 : index
    %509 = vector.load %arg6[%c0_186, %c0_187] : memref<128x128xf32, #tpu.memory_space<vmem>>, vector<128x128xf32>
    %cst_188 = arith.constant dense<0.000000e+00> : vector<64x128xf32>
    %510 = tpu.matmul %506, %509, %cst_188 {dimension_numbers = #tpu.dot_dimension_numbers<[1], [0], [0], [1], [0, 0, 1, 1], [], []>} : vector<64x128xf32>, vector<128x128xf32>, vector<64x128xf32> -> vector<64x128xf32>
    %c0_189 = arith.constant 0 : index
    %c0_190 = arith.constant 0 : index
    %511 = vector.load %arg7[%c0_189, %c0_190] : memref<128x128xf32, #tpu.memory_space<vmem>>, vector<128x128xf32>
    %cst_191 = arith.constant dense<0.000000e+00> : vector<64x128xf32>
    %512 = tpu.matmul %508, %511, %cst_191 {dimension_numbers = #tpu.dot_dimension_numbers<[1], [0], [0], [1], [0, 0, 1, 1], [], []>} : vector<64x128xf32>, vector<128x128xf32>, vector<64x128xf32> -> vector<64x128xf32>
    %513 = arith.addf %510, %512 : vector<64x128xf32>
    %c0_192 = arith.constant 0 : index
    %c0_193 = arith.constant 0 : index
    %514 = vector.load %arg8[%c0_192, %c0_193] : memref<1x128xf32, #tpu.memory_space<vmem>>, vector<1x128xf32>
    %515 = vector.broadcast %514 : vector<1x128xf32> to vector<64x128xf32>
    %516 = arith.addf %513, %515 : vector<64x128xf32>
    %517 = vector.shape_cast %516 : vector<64x128xf32> to vector<8x8x128xf32>
    %c0_194 = arith.constant 0 : index
    %c0_195 = arith.constant 0 : index
    %c0_196 = arith.constant 0 : index
    %518 = vector.load %arg9[%c0_194, %c0_195, %c0_196] : memref<8x8x128xf32, #tpu.memory_space<vmem>>, vector<8x8x128xf32>
    tpu.vector_store %arg9[%c0_194, %c0_195, %c0_196], %517 {strides = array<i32>} : memref<8x8x128xf32, #tpu.memory_space<vmem>>, vector<8x8x128xf32>,
    return
  }
  func.func @transform_0(%arg0: i32) -> (i32, i32, i32) {
    %c0_i32 = arith.constant 0 : i32
    %c0_i32_0 = arith.constant 0 : i32
    %c0_i32_1 = arith.constant 0 : i32
    return %c0_i32, %arg0, %c0_i32_0 : i32, i32, i32
  }
  func.func @transform_1(%arg0: i32) -> (i32, i32) {
    %c0_i32 = arith.constant 0 : i32
    %c0_i32_0 = arith.constant 0 : i32
    %c0_i32_1 = arith.constant 0 : i32
    return %c0_i32, %c0_i32_0 : i32, i32
  }
  func.func @transform_2(%arg0: i32) -> (i32, i32) {
    %c0_i32 = arith.constant 0 : i32
    %c0_i32_0 = arith.constant 0 : i32
    %c0_i32_1 = arith.constant 0 : i32
    return %c0_i32, %c0_i32_0 : i32, i32
  }
  func.func @transform_3(%arg0: i32) -> (i32, i32) {
    %c0_i32 = arith.constant 0 : i32
    %c0_i32_0 = arith.constant 0 : i32
    %c0_i32_1 = arith.constant 0 : i32
    return %c0_i32, %c0_i32_0 : i32, i32
  }
  func.func @transform_4(%arg0: i32) -> (i32, i32) {
    %c0_i32 = arith.constant 0 : i32
    %c0_i32_0 = arith.constant 0 : i32
    %c0_i32_1 = arith.constant 0 : i32
    return %c0_i32, %c0_i32_0 : i32, i32
  }
  func.func @transform_5(%arg0: i32) -> (i32, i32) {
    %c0_i32 = arith.constant 0 : i32
    %c0_i32_0 = arith.constant 0 : i32
    %c0_i32_1 = arith.constant 0 : i32
    return %c0_i32, %c0_i32_0 : i32, i32
  }
  func.func @transform_6(%arg0: i32) -> (i32, i32) {
    %c0_i32 = arith.constant 0 : i32
    %c0_i32_0 = arith.constant 0 : i32
    %c0_i32_1 = arith.constant 0 : i32
    return %c0_i32, %c0_i32_0 : i32, i32
  }
  func.func @transform_7(%arg0: i32) -> (i32, i32) {
    %c0_i32 = arith.constant 0 : i32
    %c0_i32_0 = arith.constant 0 : i32
    %c0_i32_1 = arith.constant 0 : i32
    return %c0_i32, %c0_i32_0 : i32, i32
  }
  func.func @transform_8(%arg0: i32) -> (i32, i32, i32) {
    %c0_i32 = arith.constant 0 : i32
    %c0_i32_0 = arith.constant 0 : i32
    %c0_i32_1 = arith.constant 0 : i32
    return %c0_i32, %arg0, %c0_i32_0 : i32, i32, i32
  }
}

</mosaic_0001>

<bundles_post_ra>
// kernel: tpu_custom_call.1
= control target key start
LH: loop header
LB: loop body
LE: loop exit
PB: predicated region body
PF: predicated region fallthrough
CT: control target
= control target key end

     0   :  { %13 = vsyncpa [#allocation6], 0  ;;  %s4252_s0 = inlined_call_operand.hbm [shape: f32[8,8,16], index: 0, kind: input, shape index: {}]   ;;  %s4253_s1 = inlined_call_operand.hbm [shape: f32[16,384], index: 1, kind: input, shape index: {}]   ;;  %s4254_s2 = inlined_call_operand.vmem [shape: f32[1,384], index: 2, kind: input, shape index: {}]   ;;  %s4255_s3 = inlined_call_operand.hbm [shape: f32[128,384], index: 3, kind: input, shape index: {}]   ;;  %s4256_s4 = inlined_call_operand.vmem [shape: f32[1,128], index: 4, kind: input, shape index: {}]   ;;  %s4257_s5 = inlined_call_operand.hbm [shape: f32[128,128], index: 5, kind: input, shape index: {}]   ;;  %s4258_s6 = inlined_call_operand.hbm [shape: f32[128,128], index: 6, kind: input, shape index: {}]   ;;  %s4259_s7 = inlined_call_operand.vmem [shape: f32[1,128], index: 7, kind: input, shape index: {}]   ;;  %s4260_s8 = inlined_call_operand.hbm [shape: f32[8,8,128], index: 8, kind: output, shape index: {}]  }
   0x1   :  { %14 = vsyncpa [#allocation9], 0 }
   0x2   :  { %15 = vsyncpa [#allocation12], 0 }
   0x3   :  { %16 = vsyncpa [#allocation7], 0  ;;  %s3542_s27 = smov [#allocation8]   ;;  %s3402_s9 = scalar_lea.hbm %s4253_s1, 768 }
   0x4   :  { %s34_s28 = sshll.u32 %s3542_s27, 4  ;;  %p3403_p0 = scmp.ne.s32.totalorder %s4253_s1, %s3402_s9  ;;  %s35_s28 = int_to_ptr.vmem [resolvable:$true] %s34_s28 }
   0x5   :  { %p3406_p1 = scmp.lt.u32.totalorder %s3402_s9, %s4253_s1 }
   0x7   :  { %p3408_p2 = pnand %p3406_p1, %p3403_p0 }
   0x9   :  { %3411 = shalt.err (!%p3408_p2)
}
   0xa   :  { %s3412_s14 = scalar_lea.vmem %s35_s28, 768  ;;  %p3417_p4 = scmp.lt.s32.totalorder %s35_s28, %s35_s28 }
   0xb   :  { %p3413_p3 = scmp.ne.s32.totalorder %s35_s28, %s3412_s14  ;;  %p3418_p5 = scmp.lt.s32.totalorder %s3412_s14, %s3412_s14 }
   0xd   :  { %p3419_p6 = por %p3418_p5, %p3417_p4 }
   0xf   :  { %p3420_p7 = pnand %p3419_p6, %p3413_p3 }
  0x11   :  { %3423 = shalt.err (!%p3420_p7)
}
  0x12   :  { %s3543_s15 = smov 384   ;;  %s3544_s16 = smov 24  }
  0x13   :  { %40 = dma.hbm_to_vmem [thread:$0]  %s4253_s1, 768, %s35_s28, [#allocation9], %s3543_s15, %s3543_s15, %s3544_s16  }
  0x14   :  { %s3545_s19 = smov [#allocation11]   ;;  %s3546_s21 = smov [#allocation5]  }
  0x15   :  { %s62_s20 = sshll.u32 %s3545_s19, 4  ;;  %s22_s22 = sshll.u32 %s3546_s21, 4  ;;  %s63_s20 = int_to_ptr.vmem [resolvable:$true] %s62_s20  ;;  %s23_s22 = int_to_ptr.vmem [resolvable:$true] %s22_s22 }
  0x16   :  { %s3424_s25 = scalar_lea.hbm %s4257_s5, 2048 }
  0x17   :  { %p3425_p8 = scmp.ne.s32.totalorder %s4257_s5, %s3424_s25  ;;  %p3428_p9 = scmp.lt.u32.totalorder %s3424_s25, %s4257_s5 }
  0x19   :  { %p3430_p10 = pnand %p3428_p9, %p3425_p8 }
  0x1b   :  { %3433 = shalt.err (!%p3430_p10)
}
  0x1c   :  { %s3434_s1 = scalar_lea.vmem %s63_s20, 2048  ;;  %p3439_p12 = scmp.lt.s32.totalorder %s63_s20, %s63_s20 }
  0x1d   :  { %p3435_p11 = scmp.ne.s32.totalorder %s63_s20, %s3434_s1  ;;  %p3440_p13 = scmp.lt.s32.totalorder %s3434_s1, %s3434_s1 }
  0x1f   :  { %p3441_p0 = por %p3440_p13, %p3439_p12 }
  0x21   :  { %p3442_p1 = pnand %p3441_p0, %p3435_p11 }
  0x23   :  { %3445 = shalt.err (!%p3442_p1)
}
  0x24   :  { %s3547_s28 = smov 128   ;;  %s3548_s9 = smov 8  }
  0x25   :  { %68 = dma.hbm_to_vmem [thread:$0]  %s4257_s5, 2048, %s63_s20, [#allocation12], %s3547_s28, %s3547_s28, %s3548_s9  }
  0x26   :  { %s3446_s14 = scalar_lea.hbm %s4252_s0, 1024 }
  0x27   :  { %p3447_p2 = scmp.ne.s32.totalorder %s4252_s0, %s3446_s14  ;;  %p3450_p3 = scmp.lt.u32.totalorder %s3446_s14, %s4252_s0 }
  0x29   :  { %p3452_p4 = pnand %p3450_p3, %p3447_p2 }
  0x2b   :  { %3455 = shalt.err (!%p3452_p4)
}
  0x2c   :  { %s3456_s23 = scalar_lea.vmem %s23_s22, 1024  ;;  %p3461_p6 = scmp.lt.s32.totalorder %s23_s22, %s23_s22 }
  0x2d   :  { %p3457_p5 = scmp.ne.s32.totalorder %s23_s22, %s3456_s23  ;;  %p3462_p7 = scmp.lt.s32.totalorder %s3456_s23, %s3456_s23 }
  0x2f   :  { %p3463_p8 = por %p3462_p7, %p3461_p6 }
  0x31   :  { %p3464_p9 = pnand %p3463_p8, %p3457_p5 }
  0x33   :  { %3467 = shalt.err (!%p3464_p9)
}
  0x34   :  { %28 = dma.hbm_to_vmem [thread:$0]  %s4252_s0, 1024, %s23_s22, [#allocation6], %s3547_s28, %s3547_s28, %s3548_s9  }
  0x35   :  { %s3549_s24 = smov [#allocation10]   ;;  %s3550_s26 = smov [#allocation13]  }
  0x36   :  { %s48_s25 = sshll.u32 %s3549_s24, 4  ;;  %s74_s27 = sshll.u32 %s3550_s26, 4  ;;  %s49_s25 = int_to_ptr.vmem [resolvable:$true] %s48_s25  ;;  %s75_s27 = int_to_ptr.vmem [resolvable:$true] %s74_s27 }
  0x37   :  { %s3468_s1 = scalar_lea.hbm %s4255_s3, 6144 }
  0x38   :  { %p3469_p10 = scmp.ne.s32.totalorder %s4255_s3, %s3468_s1  ;;  %p3472_p11 = scmp.lt.u32.totalorder %s3468_s1, %s4255_s3 }
  0x3a   :  { %p3474_p12 = pnand %p3472_p11, %p3469_p10 }
  0x3c   :  { %3477 = shalt.err (!%p3474_p12)
}
  0x3d   :  { %s3478_s0 = scalar_lea.vmem %s49_s25, 6144  ;;  %p3483_p0 = scmp.lt.s32.totalorder %s49_s25, %s49_s25 }
  0x3e   :  { %p3479_p13 = scmp.ne.s32.totalorder %s49_s25, %s3478_s0  ;;  %p3484_p1 = scmp.lt.s32.totalorder %s3478_s0, %s3478_s0 }
  0x40   :  { %p3485_p2 = por %p3484_p1, %p3483_p0 }
  0x42   :  { %p3486_p3 = pnand %p3485_p2, %p3479_p13 }
  0x44   :  { %3489 = shalt.err (!%p3486_p3)
}
  0x45   :  { %54 = dma.hbm_to_vmem [thread:$0]  %s4255_s3, 6144, %s49_s25, [#allocation9], %s3543_s15, %s3543_s15, %s3544_s16  }
  0x46   :  { %s3490_s19 = scalar_lea.hbm %s4258_s6, 2048 }
  0x47   :  { %p3491_p4 = scmp.ne.s32.totalorder %s4258_s6, %s3490_s19  ;;  %p3494_p5 = scmp.lt.u32.totalorder %s3490_s19, %s4258_s6 }
  0x49   :  { %p3496_p6 = pnand %p3494_p5, %p3491_p4 }
  0x4b   :  { %3499 = shalt.err (!%p3496_p6)
}
  0x4c   :  { %s3500_s24 = scalar_lea.vmem %s75_s27, 2048  ;;  %p3505_p8 = scmp.lt.s32.totalorder %s75_s27, %s75_s27 }
  0x4d   :  { %p3501_p7 = scmp.ne.s32.totalorder %s75_s27, %s3500_s24  ;;  %p3506_p9 = scmp.lt.s32.totalorder %s3500_s24, %s3500_s24 }
  0x4f   :  { %p3507_p10 = por %p3506_p9, %p3505_p8 }
  0x51   :  { %p3508_p11 = pnand %p3507_p10, %p3501_p7 }
  0x53   :  { %3511 = shalt.err (!%p3508_p11)
}
  0x54   :  { %80 = dma.hbm_to_vmem [thread:$0]  %s4258_s6, 2048, %s75_s27, [#allocation12], %s3547_s28, %s3547_s28, %s3548_s9  }
  0x55   :  { %3534 = dma.done.wait [#allocation6], 1024  }
  0x56   :  { %3535 = vsyncadd [#allocation6], 4294966272 }
  0x57   :  { %3536 = dma.done.wait [#allocation9], 6912  }
  0x58   :  { %3537 = vsyncadd [#allocation9], 4294960384 }
  0x59   :  { %3538 = dma.done.wait [#allocation12], 4096  }
  0x5a   :  { %3539 = vsyncadd [#allocation12], 4294963200  ;;  %v3551_v0 = vmov 0.0   ;;  %v107_v1 = vld [vmem:[#allocation8 + $0x8] sm:$0xff]  ;;  %v110_v2 = vld [vmem:[#allocation8 + $0x20] sm:$0xff]  ;;  %vm129_vm0 = vcmask 130048  }
  0x5b   :  { %218 = vmatprep.mubr.f32.mxu0 %v3551_v0  ;;  %v108_v3 = vld [vmem:[#allocation8 + $0x10] sm:$0xff]  ;;  %v2781_v4 = vpack.c.bf16 %v110_v2, %v107_v1  ;;  %v111_v5 = vld [vmem:[#allocation8 + $0x28] sm:$0xff]  ;;  %v106_v6 = vld [vmem:[#allocation8] sm:$0xff]  ;;  %vm3553_vm1 = vmmov 0   ;;  %s3554_s27 = smov [#allocation14]  }
  0x5c   :  { %v109_v7 = vld [vmem:[#allocation8 + $0x18] sm:$0xff]  ;;  %v2785_v8 = vpack.c.bf16 %v111_v5, %v108_v3  ;;  %v98_v10 = vld [vmem:[#allocation5] sm:$0xff]  ;;  %v400_v12 = vld [vmem:[#allocation10 + $0x20] sm:$0xff]  ;;  %s2155_s29 = sshll.u32 %s3554_s27, 4  ;;  %s2156_s29 = int_to_ptr.vmem [resolvable:$true] %s2155_s29 }
  0x5d   :  { %v2783_v9 = vpack.c.bf16 %v109_v7, %v106_v6  ;;  %v397_v11 = vld [vmem:[#allocation10 + $0x8] sm:$0xff]  ;;  %2782 = vmatprep.subr.bf16.mxu0 %v2781_v4  ;;  %2401 = vmatprep.mubr.msk.f32.mxu1 %vm129_vm0, %v98_v10  ;;  %v396_v13 = vld [vmem:[#allocation10] sm:$0xff]  ;;  %v399_v14 = vld [vmem:[#allocation10 + $0x18] sm:$0xff]  ;;  %v3552_v6 = vmov 0.0|0.0   ;;  %p3517_p13 = scmp.lt.s32.totalorder %s2156_s29, %s2156_s29 }
  0x5e   :  { %2786 = vmatprep.subr.bf16.mxu1 %v2785_v8  ;;  %v3677_v15 = vpack.c.bf16 %v400_v12, %v397_v11  ;;  %v403_v16 = vld [vmem:[#allocation10 + $0x38] sm:$0xff]  ;;  %v3679_v18 = vpack.c.bf16 %v399_v14, %v396_v13  ;;  %v406_v19 = vld [vmem:[#allocation10 + $0x50] sm:$0xff]  ;;  %v100_v20 = vld [vmem:[#allocation5 + $0x10] sm:$0xff] }
  0x5f   :  { %2784 = vmatpush1.bf16.msra.mxu0 %v2783_v9  ;;  %2788 = vmatpush3.bf16.msra.mxu1 %v2785_v8  ;;  %v99_v17 = vld [vmem:[#allocation5 + $0x8] sm:$0xff]  ;;  %v3682_v21 = vpack.c.bf16 %v406_v19, %v403_v16  ;;  %v402_v22 = vld [vmem:[#allocation10 + $0x30] sm:$0xff]  ;;  %v405_v23 = vld [vmem:[#allocation10 + $0x48] sm:$0xff] }
  0x60   :  { %2790 = vmatprep.subr.bf16.mxu1 %v3677_v15  ;;  %2846 = vmatprep.subr.bf16.mxu0 %v3677_v15  ;;  %v409_v24 = vld [vmem:[#allocation10 + $0x68] sm:$0xff]  ;;  %v412_v25 = vld [vmem:[#allocation10 + $0x80] sm:$0xff]  ;;  %v3690_v27 = vpack.c.bf16 %v405_v23, %v402_v22  ;;  %v102_v28 = vld [vmem:[#allocation5 + $0x20] sm:$0xff] }
  0x61   :  { %v101_v26 = vld [vmem:[#allocation5 + $0x18] sm:$0xff]  ;;  %v3693_v29 = vpack.c.bf16 %v412_v25, %v409_v24  ;;  %v408_v30 = vld [vmem:[#allocation10 + $0x60] sm:$0xff]  ;;  %v411_v31 = vld [vmem:[#allocation10 + $0x78] sm:$0xff] }
  0x62   :  { %2169 = vmatmul.mubr.msk.f32.vlgmr.msra.gmra.mrb[0].mxu0 %vm129_vm0, %v98_v10  ;;  %2402 = vmatmul.mubr.msk.f32.vlgmr.msra.gmra.mrb[0].mxu1 %vm129_vm0, %v99_v17  ;;  %v415_v32 = vld [vmem:[#allocation10 + $0x98] sm:$0xff]  ;;  %v418_v33 = vld [vmem:[#allocation10 + $0xb0] sm:$0xff]  ;;  %v3702_v35 = vpack.c.bf16 %v411_v31, %v408_v30  ;;  %v104_v36 = vld [vmem:[#allocation5 + $0x30] sm:$0xff] }
  0x63   :  { %224 = vmatprep.mubr.f32.mxu0 %v3551_v0  ;;  %2792 = vmatpush1.bf16.msra.mxu1 %v3679_v18  ;;  %v103_v34 = vld [vmem:[#allocation5 + $0x28] sm:$0xff]  ;;  %v3705_v37 = vpack.c.bf16 %v418_v33, %v415_v32  ;;  %v414_v38 = vld [vmem:[#allocation10 + $0x90] sm:$0xff]  ;;  %v417_v39 = vld [vmem:[#allocation10 + $0xa8] sm:$0xff]  ;;  %v114_v33 = vlaneseq }
  0x64   :  { %2404 = vmatprep.mubr.msk.f32.mxu1 %vm129_vm0, %v100_v20  ;;  %2794 = vmatprep.subr.bf16.mxu1 %v3682_v21  ;;  %v421_v40 = vld [vmem:[#allocation10 + $0xc8] sm:$0xff]  ;;  %v424_v41 = vld [vmem:[#allocation10 + $0xe0] sm:$0xff]  ;;  %v3714_v43 = vpack.c.bf16 %v417_v39, %v414_v38  ;;  %v423_v46 = vld [vmem:[#allocation10 + $0xd8] sm:$0xff] }
  0x65   :  { %2848 = vmatpush1.bf16.msra.mxu0 %v3679_v18  ;;  %v105_v42 = vld [vmem:[#allocation5 + $0x38] sm:$0xff]  ;;  %v3717_v44 = vpack.c.bf16 %v424_v41, %v421_v40  ;;  %v420_v45 = vld [vmem:[#allocation10 + $0xc0] sm:$0xff]  ;;  %v427_v47 = vld [vmem:[#allocation10 + $0xf8] sm:$0xff] }
  0x66   :  { %2170 = vmatmul.mubr.msk.f32.gmra.mrb[2].mxu0 %vm129_vm0, %v99_v17  ;;  %2850 = vmatprep.subr.bf16.mxu0 %v3682_v21  ;;  %v430_v48 = vld [vmem:[#allocation10 + $0x110] sm:$0xff]  ;;  %v3725_v49 = vpack.c.bf16 %v423_v46, %v420_v45  ;;  %v429_v52 = vld [vmem:[#allocation10 + $0x108] sm:$0xff]  ;;  %v436_v54 = vld [vmem:[#allocation10 + $0x140] sm:$0xff] }
  0x67   :  { %2405 = vmatmul.mubr.msk.f32.gmra.mrb[2].mxu1 %vm129_vm0, %v101_v26  ;;  %230 = vmatprep.mubr.f32.mxu0 %v3551_v0  ;;  %v3729_v50 = vpack.c.bf16 %v430_v48, %v427_v47  ;;  %v426_v51 = vld [vmem:[#allocation10 + $0xf0] sm:$0xff]  ;;  %v433_v53 = vld [vmem:[#allocation10 + $0x128] sm:$0xff]  ;;  %v432_v57 = vld [vmem:[#allocation10 + $0x120] sm:$0xff] }
  0x68   :  { %2796 = vmatpush1.bf16.msra.mxu1 %v3690_v27  ;;  %2407 = vmatprep.mubr.msk.f32.mxu1 %vm129_vm0, %v102_v28  ;;  %v3736_v55 = vpack.c.bf16 %v429_v52, %v426_v51  ;;  %v3739_v56 = vpack.c.bf16 %v436_v54, %v433_v53  ;;  %v435_v58 = vld [vmem:[#allocation10 + $0x138] sm:$0xff]  ;;  %v442_v60 = vld [vmem:[#allocation10 + $0x170] sm:$0xff]  ;;  %v441_v1 = vld [vmem:[#allocation10 + $0x168] sm:$0xff] }
  0x69   :  { %2798 = vmatprep.subr.bf16.mxu1 %v3693_v29  ;;  %2852 = vmatpush1.bf16.msra.mxu0 %v3690_v27  ;;  %v439_v59 = vld [vmem:[#allocation10 + $0x158] sm:$0xff]  ;;  %v3746_v61 = vpack.c.bf16 %v435_v58, %v432_v57  ;;  %v438_v63 = vld [vmem:[#allocation10 + $0x150] sm:$0xff]  ;;  %v401_v4 = vld [vmem:[#allocation10 + $0x28] sm:$0xff] }
  0x6a   :  { %2171 = vmatmul.mubr.msk.f32.gmra.mrb[4].mxu0 %vm129_vm0, %v100_v20  ;;  %2854 = vmatprep.subr.bf16.mxu0 %v3693_v29  ;;  %v3749_v62 = vpack.c.bf16 %v442_v60, %v439_v59  ;;  %v3756_v2 = vpack.c.bf16 %v441_v1, %v438_v63  ;;  %v398_v3 = vld [vmem:[#allocation10 + $0x10] sm:$0xff]  ;;  %v404_v7 = vld [vmem:[#allocation10 + $0x40] sm:$0xff]  ;;  %v407_v8 = vld [vmem:[#allocation10 + $0x58] sm:$0xff]  ;;  %v3834_v1 = vand.u32 127, %v114_v33 }
  0x6b   :  { %2408 = vmatmul.mubr.msk.f32.gmra.mrb[4].mxu1 %vm129_vm0, %v103_v34  ;;  %236 = vmatprep.mubr.f32.mxu0 %v3551_v0  ;;  %v3764_v5 = vpack.c.bf16 %v401_v4, %v398_v3  ;;  %v3771_v9 = vpack.c.bf16 %v407_v8, %v404_v7  ;;  %v410_v10 = vld [vmem:[#allocation10 + $0x70] sm:$0xff]  ;;  %v413_v11 = vld [vmem:[#allocation10 + $0x88] sm:$0xff]  ;;  %v416_v13 = vld [vmem:[#allocation10 + $0xa0] sm:$0xff] }
  0x6c   :  { %2800 = vmatpush1.bf16.msra.mxu1 %v3702_v35  ;;  %2410 = vmatprep.mubr.msk.f32.mxu1 %vm129_vm0, %v104_v36  ;;  %v3777_v12 = vpack.c.bf16 %v413_v11, %v410_v10  ;;  %v419_v14 = vld [vmem:[#allocation10 + $0xb8] sm:$0xff]  ;;  %v422_v17 = vld [vmem:[#allocation10 + $0xd0] sm:$0xff]  ;;  %v425_v19 = vld [vmem:[#allocation10 + $0xe8] sm:$0xff]  ;;  %vm453_vm2 = vcmp.lt.s32.totalorder %v3834_v1, 32 }
  0x6d   :  { %2802 = vmatprep.subr.bf16.mxu1 %v3705_v37  ;;  %2856 = vmatpush1.bf16.msra.mxu0 %v3702_v35  ;;  %v3781_v16 = vpack.c.bf16 %v419_v14, %v416_v13  ;;  %v3785_v20 = vpack.c.bf16 %v425_v19, %v422_v17  ;;  %v428_v22 = vld [vmem:[#allocation10 + $0x100] sm:$0xff]  ;;  %v431_v23 = vld [vmem:[#allocation10 + $0x118] sm:$0xff]  ;;  %v434_v25 = vld [vmem:[#allocation10 + $0x130] sm:$0xff] }
  0x6e   :  { %2172 = vmatmul.mubr.msk.f32.gmra.mrb[6].mxu0 %vm129_vm0, %v101_v26  ;;  %2858 = vmatprep.subr.bf16.mxu0 %v3705_v37  ;;  %v3789_v24 = vpack.c.bf16 %v431_v23, %v428_v22  ;;  %v437_v26 = vld [vmem:[#allocation10 + $0x148] sm:$0xff]  ;;  %v440_v30 = vld [vmem:[#allocation10 + $0x160] sm:$0xff]  ;;  %v443_v31 = vld [vmem:[#allocation10 + $0x178] sm:$0xff] }
  0x6f   :  { %2411 = vmatmul.mubr.msk.f32.gmra.mrb[6].mxu1 %vm129_vm0, %v105_v42  ;;  %242 = vmatprep.mubr.f32.mxu0 %v3551_v0  ;;  %v3797_v32 = vpack.c.bf16 %v443_v31, %v440_v30  ;;  %v112_v38 = vld [vmem:[%s4254_s2] sm:$0x7] }
  0x70   :  { %2804 = vmatpush1.bf16.msra.mxu1 %v3714_v43  ;;  %518 = vmatprep.mubr.f32.mxu1 %v3551_v0 }
  0x71   :  { %2806 = vmatprep.subr.bf16.mxu1 %v3717_v44  ;;  %2860 = vmatpush1.bf16.msra.mxu0 %v3714_v43 }
  0x72   :  { %2173 = vmatmul.mubr.msk.f32.gmra.mrb[8].mxu0 %vm129_vm0, %v102_v28  ;;  %2862 = vmatprep.subr.bf16.mxu0 %v3717_v44  ;;  %v3793_v28 = vpack.c.bf16 %v437_v26, %v434_v25 }
  0x73   :  { %248 = vmatprep.mubr.f32.mxu0 %v3551_v0 }
  0x74   :  { %2808 = vmatpush1.bf16.msra.mxu1 %v3725_v49 }
  0x75   :  { %2810 = vmatprep.subr.bf16.mxu1 %v3729_v50  ;;  %2864 = vmatpush1.bf16.msra.mxu0 %v3725_v49 }
  0x76   :  { %2174 = vmatmul.mubr.msk.f32.gmra.mrb[10].mxu0 %vm129_vm0, %v103_v34  ;;  %2866 = vmatprep.subr.bf16.mxu0 %v3729_v50  ;;  %v115_v34 = vshrl.u32 %v114_v33, 7 }
  0x77   :  { %254 = vmatprep.mubr.f32.mxu0 %v3551_v0 }
  0x78   :  { %2812 = vmatpush1.bf16.msra.mxu1 %v3736_v55  ;;  %v116_v40 = vsub.s32 0, %v115_v34 }
  0x79   :  { %2814 = vmatprep.subr.bf16.mxu1 %v3739_v56  ;;  %2868 = vmatpush1.bf16.msra.mxu0 %v3736_v55 }
  0x7a   :  { %2175 = vmatmul.mubr.msk.f32.gmra.mrb[12].mxu0 %vm129_vm0, %v104_v36  ;;  %2870 = vmatprep.subr.bf16.mxu0 %v3739_v56  ;;  %v124_v36 = vsub.s32 2, %v115_v34  ;;  %v3828_v51 = vrot.slane %v112_v38, %v116_v40 }
  0x7b   :  { %260 = vmatprep.mubr.f32.mxu0 %v3551_v0 }
  0x7c   :  { %2816 = vmatpush1.bf16.msra.mxu1 %v3746_v61  ;;  %v125_v39 = vrot.slane %v112_v38, %v124_v36 }
  0x7d   :  { %2818 = vmatprep.subr.bf16.mxu1 %v3749_v62  ;;  %2872 = vmatpush1.bf16.msra.mxu0 %v3746_v61 }
  0x7e   :  { %2176 = vmatmul.mubr.msk.f32.gmra.mrb[14].mxu0 %vm129_vm0, %v105_v42  ;;  %2874 = vmatprep.subr.bf16.mxu0 %v3749_v62  ;;  %v120_v42 = vsub.s32 1, %v115_v34 }
  0x7f   :  { %696 = vmatprep.mubr.f32.mxu0 %v3551_v0 }
  0x80   :  { %2820 = vmatpush1.bf16.msra.mxu1 %v3756_v2  ;;  %v3830_v52 = vrot.slane %v112_v38, %v120_v42 }
  0x81   :  { %2821 = vmatprep.subr.bf16.mxu1 %v3552_v6  ;;  %2876 = vmatpush1.bf16.msra.mxu0 %v3756_v2 }
  0x82   :  { %2902 = vmatprep.subr.bf16.mxu0 %v3677_v15 }
  0x83   :  { %519 = vmatmul.mubr.f32.vlgmr.msra.gmra.mrb[8].mxu1 %v3551_v0 }
  0x84   :  { %2823 = vmatpush3.bf16.msra.mxu1 %v3764_v5  ;;  %2445 = vmatprep.mubr.msk.f32.mxu1 %vm3553_vm1, %v3551_v0 }
  0x85   :  { %2824 = vmatprep.subr.bf16.mxu1 %v3552_v6 }
  0x88   :  { %2826 = vmatpush3.bf16.msra.mxu1 %v3771_v9 }
  0x89   :  { %2827 = vmatprep.subr.bf16.mxu1 %v3552_v6 }
  0x8c   :  { %2829 = vmatpush3.bf16.msra.mxu1 %v3777_v12 }
  0x8d   :  { %2830 = vmatprep.subr.bf16.mxu1 %v3552_v6 }
  0x90   :  { %2832 = vmatpush3.bf16.msra.mxu1 %v3781_v16 }
  0x91   :  { %2833 = vmatprep.subr.bf16.mxu1 %v3552_v6 }
  0x94   :  { %2835 = vmatpush3.bf16.msra.mxu1 %v3785_v20 }
  0x95   :  { %2836 = vmatprep.subr.bf16.mxu1 %v3552_v6 }
  0x98   :  { %2838 = vmatpush3.bf16.msra.mxu1 %v3789_v24 }
  0x99   :  { %2839 = vmatprep.subr.bf16.mxu1 %v3552_v6 }
  0x9c   :  { %2841 = vmatpush3.bf16.msra.mxu1 %v3793_v28 }
  0x9d   :  { %2842 = vmatprep.subr.bf16.mxu1 %v3552_v6 }
  0xa0   :  { %2844 = vmatpush3.bf16.msra.mxu1 %v3797_v32 }
  0xa1   :  { %2877 = vmatprep.subr.bf16.mxu1 %v3552_v6 }
  0xa3   :  { %2446 = vmatmul.mubr.f32.vlgmr.msra.gmra.mrb[10].mxu1 %v3551_v0 }
  0xa4   :  { %2879 = vmatpush3.bf16.msra.mxu1 %v3764_v5  ;;  %2480 = vmatprep.mubr.msk.f32.mxu1 %vm3553_vm1, %v3551_v0 }
  0xa5   :  { %2880 = vmatprep.subr.bf16.mxu1 %v3552_v6 }
  0xa8   :  { %2882 = vmatpush3.bf16.msra.mxu1 %v3771_v9 }
  0xa9   :  { %2883 = vmatprep.subr.bf16.mxu1 %v3552_v6 }
  0xac   :  { %2885 = vmatpush3.bf16.msra.mxu1 %v3777_v12 }
  0xad   :  { %2886 = vmatprep.subr.bf16.mxu1 %v3552_v6 }
  0xb0   :  { %2888 = vmatpush3.bf16.msra.mxu1 %v3781_v16 }
  0xb1   :  { %2889 = vmatprep.subr.bf16.mxu1 %v3552_v6 }
  0xb4   :  { %2891 = vmatpush3.bf16.msra.mxu1 %v3785_v20 }
  0xb5   :  { %2892 = vmatprep.subr.bf16.mxu1 %v3552_v6 }
  0xb8   :  { %2894 = vmatpush3.bf16.msra.mxu1 %v3789_v24 }
  0xb9   :  { %2895 = vmatprep.subr.bf16.mxu1 %v3552_v6 }
  0xbc   :  { %2897 = vmatpush3.bf16.msra.mxu1 %v3793_v28 }
  0xbd   :  { %2898 = vmatprep.subr.bf16.mxu1 %v3552_v6 }
  0xc0   :  { %2900 = vmatpush3.bf16.msra.mxu1 %v3797_v32 }
  0xc1   :  { %2933 = vmatprep.subr.bf16.mxu1 %v3552_v6 }
 0x135   :  { %v3824_v41 = vpop.f32.mrb[0].mxu0  ;;  %v2403_v45 = vpop.f32.mrb[0].mxu1 }
 0x136   :  { %v3826_v46 = vpop.f32.mrb[1].mxu0  ;;  %v339_v47 = vadd.f32 %v2403_v45, %v125_v39  ;;  %v333_v48 = vpop.f32.mrb[1].mxu1 }
 0x137   :  { %v334_v34 = vadd.f32 %v333_v48, %v125_v39 }
 0x139   :  { %v226_v53 = vpop.f32.mrb[2].mxu0 }
 0x13a   :  { %v2406_v54 = vpop.f32.mrb[2].mxu1  ;;  %v227_v57 = vadd.f32 %v226_v53, %v3828_v51  ;;  %v228_v58 = vpop.f32.mrb[3].mxu0 }
 0x13b   :  { %v349_v59 = vadd.f32 %v2406_v54, %v125_v39  ;;  %v343_v60 = vpop.f32.mrb[3].mxu1  ;;  %v229_v63 = vadd.f32 %v228_v58, %v3830_v52 }
 0x13c   :  { %v344_v3 = vadd.f32 %v343_v60, %v125_v39 }
 0x13d   :  { %v232_v4 = vpop.f32.mrb[4].mxu0 }
 0x13e   :  { %v2409_v7 = vpop.f32.mrb[4].mxu1  ;;  %v233_v8 = vadd.f32 %v232_v4, %v3828_v51  ;;  %v234_v10 = vpop.f32.mrb[5].mxu0 }
 0x13f   :  { %v359_v11 = vadd.f32 %v2409_v7, %v125_v39  ;;  %v353_v13 = vpop.f32.mrb[5].mxu1  ;;  %v235_v14 = vadd.f32 %v234_v10, %v3830_v52 }
 0x140   :  { %v354_v17 = vadd.f32 %v353_v13, %v125_v39 }
 0x141   :  { %v3841_v19 = vsel %vm453_vm2, %v344_v3, %v359_v11  ;;  %v3845_v22 = vsel %vm453_vm2, %v359_v11, %v344_v3  ;;  %v238_v23 = vpop.f32.mrb[6].mxu0 }
 0x142   :  { %v3849_v25 = vsel %vm453_vm2, %v349_v59, %v354_v17  ;;  %v3853_v26 = vsel %vm453_vm2, %v354_v17, %v349_v59  ;;  %v2412_v30 = vpop.f32.mrb[6].mxu1  ;;  %v239_v31 = vadd.f32 %v238_v23, %v3828_v51  ;;  %v240_v33 = vpop.f32.mrb[7].mxu0 }
 0x143   :  { %v369_v36 = vadd.f32 %v2412_v30, %v125_v39  ;;  %v363_v38 = vpop.f32.mrb[7].mxu1  ;;  %v241_v40 = vadd.f32 %v240_v33, %v3830_v52 }
 0x144   :  { %v364_v42 = vadd.f32 %v363_v38, %v125_v39 }
 0x145   :  { %v620_v45 = vsel %vm453_vm2, %v334_v34, %v369_v36  ;;  %v3861_v53 = vsel %vm453_vm2, %v369_v36, %v334_v34  ;;  %v244_v54 = vpop.f32.mrb[8].mxu0 }
 0x146   :  { %v3865_v58 = vsel %vm453_vm2, %v339_v47, %v364_v42  ;;  %v3869_v48 = vsel %vm453_vm2, %v364_v42, %v339_v47  ;;  %v245_v59 = vadd.f32 %v244_v54, %v3828_v51  ;;  %v246_v60 = vpop.f32.mrb[9].mxu0 }
 0x147   :  { %v247_v39 = vadd.f32 %v246_v60, %v3830_v52  ;;  %v221_v60 = vadd.f32 %v3824_v41, %v3828_v51 }
 0x148   :  { %v3875_v3 = vsel %vm453_vm2, %v239_v31, %v245_v59  ;;  %v3879_v4 = vsel %vm453_vm2, %v245_v59, %v239_v31 }
 0x149   :  { %v250_v7 = vpop.f32.mrb[10].mxu0  ;;  %v3883_v10 = vsel %vm453_vm2, %v241_v40, %v247_v39  ;;  %v3887_v47 = vsel %vm453_vm2, %v247_v39, %v241_v40 }
 0x14a   :  { %v251_v11 = vadd.f32 %v250_v7, %v3828_v51  ;;  %v252_v13 = vpop.f32.mrb[11].mxu0 }
 0x14b   :  { %v253_v17 = vadd.f32 %v252_v13, %v3830_v52 }
 0x14c   :  { %v3893_v23 = vsel %vm453_vm2, %v233_v8, %v251_v11  ;;  %v3897_v30 = vsel %vm453_vm2, %v251_v11, %v233_v8  ;;  %v223_v11 = vadd.f32 %v3826_v46, %v3830_v52 }
 0x14d   :  { %v256_v31 = vpop.f32.mrb[12].mxu0  ;;  %v3901_v33 = vsel %vm453_vm2, %v235_v14, %v253_v17  ;;  %v3905_v34 = vsel %vm453_vm2, %v253_v17, %v235_v14 }
 0x14e   :  { %v257_v36 = vadd.f32 %v256_v31, %v3828_v51  ;;  %v258_v38 = vpop.f32.mrb[13].mxu0 }
 0x14f   :  { %v259_v40 = vadd.f32 %v258_v38, %v3830_v52 }
 0x150   :  { %v3911_v42 = vsel %vm453_vm2, %v227_v57, %v257_v36  ;;  %v3915_v8 = vsel %vm453_vm2, %v257_v36, %v227_v57 }
 0x151   :  { %v262_v54 = vpop.f32.mrb[14].mxu0  ;;  %v3919_v59 = vsel %vm453_vm2, %v229_v63, %v259_v40  ;;  %v3923_v14 = vsel %vm453_vm2, %v259_v40, %v229_v63 }
 0x152   :  { %v263_v39 = vadd.f32 %v262_v54, %v3828_v51  ;;  %v264_v7 = vpop.f32.mrb[15].mxu0 }
 0x153   :  { %v265_v57 = vadd.f32 %v264_v7, %v3830_v52 }
 0x154   :  { %v600_v13 = vsel %vm453_vm2, %v221_v60, %v263_v39  ;;  %v3935_v17 = vsel %vm453_vm2, %v263_v39, %v221_v60  ;;  %v3946_v39 = vld [vmem:[%s4256_s4] ss:$0 sm:$0xff] }
 0x155   :  { %v610_v63 = vsel %vm453_vm2, %v223_v11, %v265_v57  ;;  %v3941_v41 = vsel %vm453_vm2, %v265_v57, %v223_v11 }
 0x156   :  { %v520_v51 = vpop.f32.mrb[8].mxu1 }
 0x157   :  { %v601_v31 = vadd.f32 %v600_v13, %v520_v51  ;;  %v522_v36 = vpop.f32.mrb[9].mxu1 }
 0x158   :  { %v611_v46 = vadd.f32 %v610_v63, %v522_v36 }
 0x159   :  { %v2186_v38 = vmul.f32 -1.442695, %v601_v31 }
 0x15a   :  { %v2187_v52 = vmul.f32 -1.442695, %v611_v46 }
 0x15b   :  { %3322 = vpow2.f32 %v2186_v38 }
 0x15c   :  { %3324 = vpow2.f32 %v2187_v52 }
 0x165   :  { %v3323_v40 = vpop.eup %3322 }
 0x166   :  { %v605_v54 = vadd.f32 1.0, %v3323_v40  ;;  %v3325_v60 = vpop.eup %3324 }
 0x167   :  { %v615_v1 = vadd.f32 1.0, %v3325_v60 }
 0x168   :  { %3326 = vrcp.f32 %v605_v54 }
 0x169   :  { %3328 = vrcp.f32 %v615_v1 }
 0x172   :  { %v3327_v13 = vpop.eup %3326 }
 0x173   :  { %v3329_v31 = vpop.eup %3328 }
 0x174   :  { %v625_v36 = vsub.f32 1.0, %v3329_v31  ;;  %v627_v52 = vmul.f32 0.0, %v3329_v31 }
 0x176   :  { %v591_v7 = vpop.f32.mrb[10].mxu1 }
 0x177   :  { %v621_v11 = vadd.f32 %v3946_v39, %v591_v7  ;;  %v2447_v57 = vpop.f32.mrb[11].mxu1 }
 0x179   :  { %v622_v63 = vmul.f32 %v3327_v13, %v621_v11 }
 0x17b   :  { %v623_v51 = vadd.f32 %v622_v63, %v620_v45 }
 0x17d   :  { %3330 = vtanh.f32 %v623_v51 }
 0x187   :  { %v3331_v46 = vpop.eup %3330 }
 0x188   :  { %v626_v38 = vmul.f32 %v3331_v46, %v625_v36 }
 0x18a   :  { %v3949_v40 = vadd.f32 %v627_v52, %v626_v38 }
 0x18c   :  { %697 = vmatmul.mubr.f32.vlgmr.msra.gmra.mrb[16].mxu0 %v3949_v40  ;;  %2481 = vmatmul.mubr.f32.vlgmr.msra.gmra.mrb[12].mxu1 %v3949_v40 }
 0x18d   :  { %2904 = vmatpush1.bf16.msra.mxu0 %v3679_v18  ;;  %2935 = vmatpush3.bf16.msra.mxu1 %v3764_v5 }
 0x18e   :  { %2906 = vmatprep.subr.bf16.mxu0 %v3682_v21  ;;  %2936 = vmatprep.subr.bf16.mxu1 %v3552_v6 }
 0x18f   :  { %874 = vmatprep.mubr.f32.mxu0 %v3551_v0  ;;  %2515 = vmatprep.mubr.msk.f32.mxu1 %vm3553_vm1, %v3551_v0 }
 0x191   :  { %2908 = vmatpush1.bf16.msra.mxu0 %v3690_v27  ;;  %2938 = vmatpush3.bf16.msra.mxu1 %v3771_v9 }
 0x192   :  { %2910 = vmatprep.subr.bf16.mxu0 %v3693_v29  ;;  %2939 = vmatprep.subr.bf16.mxu1 %v3552_v6 }
 0x195   :  { %2912 = vmatpush1.bf16.msra.mxu0 %v3702_v35  ;;  %2941 = vmatpush3.bf16.msra.mxu1 %v3777_v12 }
 0x196   :  { %2914 = vmatprep.subr.bf16.mxu0 %v3705_v37  ;;  %2942 = vmatprep.subr.bf16.mxu1 %v3552_v6 }
 0x199   :  { %2916 = vmatpush1.bf16.msra.mxu0 %v3714_v43  ;;  %2944 = vmatpush3.bf16.msra.mxu1 %v3781_v16 }
 0x19a   :  { %2918 = vmatprep.subr.bf16.mxu0 %v3717_v44  ;;  %2945 = vmatprep.subr.bf16.mxu1 %v3552_v6 }
 0x19d   :  { %2920 = vmatpush1.bf16.msra.mxu0 %v3725_v49  ;;  %2947 = vmatpush3.bf16.msra.mxu1 %v3785_v20 }
 0x19e   :  { %2922 = vmatprep.subr.bf16.mxu0 %v3729_v50  ;;  %2948 = vmatprep.subr.bf16.mxu1 %v3552_v6 }
 0x1a1   :  { %2924 = vmatpush1.bf16.msra.mxu0 %v3736_v55  ;;  %2950 = vmatpush3.bf16.msra.mxu1 %v3789_v24 }
 0x1a2   :  { %2926 = vmatprep.subr.bf16.mxu0 %v3739_v56  ;;  %2951 = vmatprep.subr.bf16.mxu1 %v3552_v6 }
 0x1a5   :  { %2928 = vmatpush1.bf16.msra.mxu0 %v3746_v61  ;;  %2953 = vmatpush3.bf16.msra.mxu1 %v3793_v28 }
 0x1a6   :  { %2930 = vmatprep.subr.bf16.mxu0 %v3749_v62  ;;  %2954 = vmatprep.subr.bf16.mxu1 %v3552_v6 }
 0x1a9   :  { %2932 = vmatpush1.bf16.msra.mxu0 %v3756_v2  ;;  %2956 = vmatpush3.bf16.msra.mxu1 %v3797_v32 }
 0x1aa   :  { %2958 = vmatprep.subr.bf16.mxu0 %v3677_v15  ;;  %2989 = vmatprep.subr.bf16.mxu1 %v3552_v6 }
 0x25f   :  { %v698_v45 = vpop.f32.mrb[16].mxu0  ;;  %v769_v54 = vpop.f32.mrb[12].mxu1 }
 0x260   :  { %v778_v60 = vadd.f32 %v3911_v42, %v698_v45  ;;  %v700_v1 = vpop.f32.mrb[17].mxu0  ;;  %v2482_v7 = vpop.f32.mrb[13].mxu1  ;;  %v798_v46 = vadd.f32 %v3946_v39, %v769_v54 }
 0x261   :  { %v788_v11 = vadd.f32 %v3919_v59, %v700_v1 }
 0x262   :  { %v2188_v57 = vmul.f32 -1.442695, %v778_v60 }
 0x263   :  { %v2189_v13 = vmul.f32 -1.442695, %v788_v11 }
 0x264   :  { %3332 = vpow2.f32 %v2188_v57 }
 0x265   :  { %3334 = vpow2.f32 %v2189_v13 }
 0x26e   :  { %v3333_v63 = vpop.eup %3332 }
 0x26f   :  { %v782_v51 = vadd.f32 1.0, %v3333_v63  ;;  %v3335_v31 = vpop.eup %3334 }
 0x270   :  { %v792_v36 = vadd.f32 1.0, %v3335_v31 }
 0x271   :  { %3336 = vrcp.f32 %v782_v51 }
 0x272   :  { %3338 = vrcp.f32 %v792_v36 }
 0x27b   :  { %v3337_v38 = vpop.eup %3336 }
 0x27c   :  { %v799_v52 = vmul.f32 %v3337_v38, %v798_v46  ;;  %v3339_v45 = vpop.eup %3338 }
 0x27d   :  { %v802_v7 = vsub.f32 1.0, %v3339_v45  ;;  %v804_v1 = vmul.f32 %v3339_v45, %v3949_v40 }
 0x27e   :  { %v800_v42 = vadd.f32 %v799_v52, %v3865_v58 }
 0x280   :  { %3340 = vtanh.f32 %v800_v42 }
 0x28a   :  { %v3341_v59 = vpop.eup %3340 }
 0x28b   :  { %v803_v60 = vmul.f32 %v3341_v59, %v802_v7 }
 0x28d   :  { %v3993_v11 = vadd.f32 %v804_v1, %v803_v60 }
 0x28f   :  { %875 = vmatmul.mubr.f32.vlgmr.msra.gmra.mrb[18].mxu0 %v3993_v11  ;;  %2516 = vmatmul.mubr.f32.vlgmr.msra.gmra.mrb[14].mxu1 %v3993_v11 }
 0x290   :  { %2960 = vmatpush1.bf16.msra.mxu0 %v3679_v18  ;;  %2991 = vmatpush3.bf16.msra.mxu1 %v3764_v5 }
 0x291   :  { %2962 = vmatprep.subr.bf16.mxu0 %v3682_v21  ;;  %2992 = vmatprep.subr.bf16.mxu1 %v3552_v6 }
 0x292   :  { %1052 = vmatprep.mubr.f32.mxu0 %v3551_v0  ;;  %2550 = vmatprep.mubr.msk.f32.mxu1 %vm3553_vm1, %v3551_v0 }
 0x294   :  { %2964 = vmatpush1.bf16.msra.mxu0 %v3690_v27  ;;  %2994 = vmatpush3.bf16.msra.mxu1 %v3771_v9 }
 0x295   :  { %2966 = vmatprep.subr.bf16.mxu0 %v3693_v29  ;;  %2995 = vmatprep.subr.bf16.mxu1 %v3552_v6 }
 0x298   :  { %2968 = vmatpush1.bf16.msra.mxu0 %v3702_v35  ;;  %2997 = vmatpush3.bf16.msra.mxu1 %v3777_v12 }
 0x299   :  { %2970 = vmatprep.subr.bf16.mxu0 %v3705_v37  ;;  %2998 = vmatprep.subr.bf16.mxu1 %v3552_v6 }
 0x29c   :  { %2972 = vmatpush1.bf16.msra.mxu0 %v3714_v43  ;;  %3000 = vmatpush3.bf16.msra.mxu1 %v3781_v16 }
 0x29d   :  { %2974 = vmatprep.subr.bf16.mxu0 %v3717_v44  ;;  %3001 = vmatprep.subr.bf16.mxu1 %v3552_v6 }
 0x2a0   :  { %2976 = vmatpush1.bf16.msra.mxu0 %v3725_v49  ;;  %3003 = vmatpush3.bf16.msra.mxu1 %v3785_v20 }
 0x2a1   :  { %2978 = vmatprep.subr.bf16.mxu0 %v3729_v50  ;;  %3004 = vmatprep.subr.bf16.mxu1 %v3552_v6 }
 0x2a4   :  { %2980 = vmatpush1.bf16.msra.mxu0 %v3736_v55  ;;  %3006 = vmatpush3.bf16.msra.mxu1 %v3789_v24 }
 0x2a5   :  { %2982 = vmatprep.subr.bf16.mxu0 %v3739_v56  ;;  %3007 = vmatprep.subr.bf16.mxu1 %v3552_v6 }
 0x2a8   :  { %2984 = vmatpush1.bf16.msra.mxu0 %v3746_v61  ;;  %3009 = vmatpush3.bf16.msra.mxu1 %v3793_v28 }
 0x2a9   :  { %2986 = vmatprep.subr.bf16.mxu0 %v3749_v62  ;;  %3010 = vmatprep.subr.bf16.mxu1 %v3552_v6 }
 0x2ac   :  { %2988 = vmatpush1.bf16.msra.mxu0 %v3756_v2  ;;  %3012 = vmatpush3.bf16.msra.mxu1 %v3797_v32 }
 0x2ad   :  { %3014 = vmatprep.subr.bf16.mxu0 %v3677_v15  ;;  %3045 = vmatprep.subr.bf16.mxu1 %v3552_v6 }
 0x362   :  { %v876_v58 = vpop.f32.mrb[18].mxu0  ;;  %v947_v54 = vpop.f32.mrb[14].mxu1 }
 0x363   :  { %v956_v57 = vadd.f32 %v3893_v23, %v876_v58  ;;  %v878_v13 = vpop.f32.mrb[19].mxu0  ;;  %v2517_v63 = vpop.f32.mrb[15].mxu1  ;;  %v976_v45 = vadd.f32 %v3946_v39, %v947_v54 }
 0x364   :  { %v966_v51 = vadd.f32 %v3901_v33, %v878_v13 }
 0x365   :  { %v2190_v31 = vmul.f32 -1.442695, %v956_v57 }
 0x366   :  { %v2191_v36 = vmul.f32 -1.442695, %v966_v51 }
 0x367   :  { %3342 = vpow2.f32 %v2190_v31 }
 0x368   :  { %3344 = vpow2.f32 %v2191_v36 }
 0x371   :  { %v3343_v46 = vpop.eup %3342 }
 0x372   :  { %v960_v38 = vadd.f32 1.0, %v3343_v46  ;;  %v3345_v52 = vpop.eup %3344 }
 0x373   :  { %v970_v42 = vadd.f32 1.0, %v3345_v52 }
 0x374   :  { %3346 = vrcp.f32 %v960_v38 }
 0x375   :  { %3348 = vrcp.f32 %v970_v42 }
 0x37e   :  { %v3347_v7 = vpop.eup %3346 }
 0x37f   :  { %v977_v59 = vmul.f32 %v3347_v7, %v976_v45  ;;  %v3349_v60 = vpop.eup %3348 }
 0x380   :  { %v980_v1 = vsub.f32 1.0, %v3349_v60  ;;  %v982_v57 = vmul.f32 %v3349_v60, %v3993_v11 }
 0x381   :  { %v978_v23 = vadd.f32 %v977_v59, %v3841_v19 }
 0x383   :  { %3350 = vtanh.f32 %v978_v23 }
 0x38d   :  { %v3351_v33 = vpop.eup %3350 }
 0x38e   :  { %v981_v58 = vmul.f32 %v3351_v33, %v980_v1 }
 0x390   :  { %v4037_v13 = vadd.f32 %v982_v57, %v981_v58 }
 0x392   :  { %1053 = vmatmul.mubr.f32.vlgmr.msra.gmra.mrb[20].mxu0 %v4037_v13  ;;  %2551 = vmatmul.mubr.f32.vlgmr.msra.gmra.mrb[16].mxu1 %v4037_v13 }
 0x393   :  { %3016 = vmatpush1.bf16.msra.mxu0 %v3679_v18  ;;  %3047 = vmatpush3.bf16.msra.mxu1 %v3764_v5 }
 0x394   :  { %3018 = vmatprep.subr.bf16.mxu0 %v3682_v21  ;;  %3048 = vmatprep.subr.bf16.mxu1 %v3552_v6 }
 0x395   :  { %1230 = vmatprep.mubr.f32.mxu0 %v3551_v0  ;;  %2585 = vmatprep.mubr.msk.f32.mxu1 %vm3553_vm1, %v3551_v0 }
 0x397   :  { %3020 = vmatpush1.bf16.msra.mxu0 %v3690_v27  ;;  %3050 = vmatpush3.bf16.msra.mxu1 %v3771_v9 }
 0x398   :  { %3022 = vmatprep.subr.bf16.mxu0 %v3693_v29  ;;  %3051 = vmatprep.subr.bf16.mxu1 %v3552_v6 }
 0x39b   :  { %3024 = vmatpush1.bf16.msra.mxu0 %v3702_v35  ;;  %3053 = vmatpush3.bf16.msra.mxu1 %v3777_v12 }
 0x39c   :  { %3026 = vmatprep.subr.bf16.mxu0 %v3705_v37  ;;  %3054 = vmatprep.subr.bf16.mxu1 %v3552_v6 }
 0x39f   :  { %3028 = vmatpush1.bf16.msra.mxu0 %v3714_v43  ;;  %3056 = vmatpush3.bf16.msra.mxu1 %v3781_v16 }
 0x3a0   :  { %3030 = vmatprep.subr.bf16.mxu0 %v3717_v44  ;;  %3057 = vmatprep.subr.bf16.mxu1 %v3552_v6 }
 0x3a3   :  { %3032 = vmatpush1.bf16.msra.mxu0 %v3725_v49  ;;  %3059 = vmatpush3.bf16.msra.mxu1 %v3785_v20 }
 0x3a4   :  { %3034 = vmatprep.subr.bf16.mxu0 %v3729_v50  ;;  %3060 = vmatprep.subr.bf16.mxu1 %v3552_v6 }
 0x3a7   :  { %3036 = vmatpush1.bf16.msra.mxu0 %v3736_v55  ;;  %3062 = vmatpush3.bf16.msra.mxu1 %v3789_v24 }
 0x3a8   :  { %3038 = vmatprep.subr.bf16.mxu0 %v3739_v56  ;;  %3063 = vmatprep.subr.bf16.mxu1 %v3552_v6 }
 0x3ab   :  { %3040 = vmatpush1.bf16.msra.mxu0 %v3746_v61  ;;  %3065 = vmatpush3.bf16.msra.mxu1 %v3793_v28 }
 0x3ac   :  { %3042 = vmatprep.subr.bf16.mxu0 %v3749_v62  ;;  %3066 = vmatprep.subr.bf16.mxu1 %v3552_v6 }
 0x3af   :  { %3044 = vmatpush1.bf16.msra.mxu0 %v3756_v2  ;;  %3068 = vmatpush3.bf16.msra.mxu1 %v3797_v32 }
 0x3b0   :  { %3070 = vmatprep.subr.bf16.mxu0 %v3677_v15  ;;  %3101 = vmatprep.subr.bf16.mxu1 %v3552_v6 }
 0x465   :  { %v1054_v19 = vpop.f32.mrb[20].mxu0  ;;  %v1125_v54 = vpop.f32.mrb[16].mxu1 }
 0x466   :  { %v1134_v63 = vadd.f32 %v3875_v3, %v1054_v19  ;;  %v1056_v51 = vpop.f32.mrb[21].mxu0  ;;  %v2552_v31 = vpop.f32.mrb[17].mxu1  ;;  %v1154_v59 = vadd.f32 %v3946_v39, %v1125_v54 }
 0x467   :  { %v1144_v36 = vadd.f32 %v3883_v10, %v1056_v51 }
 0x468   :  { %v2192_v46 = vmul.f32 -1.442695, %v1134_v63 }
 0x469   :  { %v2193_v38 = vmul.f32 -1.442695, %v1144_v36 }
 0x46a   :  { %3352 = vpow2.f32 %v2192_v46 }
 0x46b   :  { %3354 = vpow2.f32 %v2193_v38 }
 0x474   :  { %v3353_v52 = vpop.eup %3352 }
 0x475   :  { %v1138_v42 = vadd.f32 1.0, %v3353_v52  ;;  %v3355_v45 = vpop.eup %3354 }
 0x476   :  { %v1148_v7 = vadd.f32 1.0, %v3355_v45 }
 0x477   :  { %3356 = vrcp.f32 %v1138_v42 }
 0x478   :  { %3358 = vrcp.f32 %v1148_v7 }
 0x481   :  { %v3357_v23 = vpop.eup %3356 }
 0x482   :  { %v1155_v60 = vmul.f32 %v3357_v23, %v1154_v59  ;;  %v3359_v1 = vpop.eup %3358 }
 0x483   :  { %v1158_v33 = vsub.f32 1.0, %v3359_v1  ;;  %v1160_v57 = vmul.f32 %v3359_v1, %v4037_v13 }
 0x484   :  { %v1156_v3 = vadd.f32 %v1155_v60, %v3849_v25 }
 0x486   :  { %3360 = vtanh.f32 %v1156_v3 }
 0x490   :  { %v3361_v10 = vpop.eup %3360 }
 0x491   :  { %v1159_v58 = vmul.f32 %v3361_v10, %v1158_v33 }
 0x493   :  { %v4081_v19 = vadd.f32 %v1160_v57, %v1159_v58 }
 0x495   :  { %1231 = vmatmul.mubr.f32.vlgmr.msra.gmra.mrb[22].mxu0 %v4081_v19  ;;  %2586 = vmatmul.mubr.f32.vlgmr.msra.gmra.mrb[18].mxu1 %v4081_v19 }
 0x496   :  { %3072 = vmatpush1.bf16.msra.mxu0 %v3679_v18  ;;  %3103 = vmatpush3.bf16.msra.mxu1 %v3764_v5 }
 0x497   :  { %3074 = vmatprep.subr.bf16.mxu0 %v3682_v21  ;;  %3104 = vmatprep.subr.bf16.mxu1 %v3552_v6 }
 0x498   :  { %1406 = vmatprep.mubr.f32.mxu0 %v3551_v0  ;;  %2620 = vmatprep.mubr.msk.f32.mxu1 %vm3553_vm1, %v3551_v0 }
 0x49a   :  { %3076 = vmatpush1.bf16.msra.mxu0 %v3690_v27  ;;  %3106 = vmatpush3.bf16.msra.mxu1 %v3771_v9 }
 0x49b   :  { %3078 = vmatprep.subr.bf16.mxu0 %v3693_v29  ;;  %3107 = vmatprep.subr.bf16.mxu1 %v3552_v6 }
 0x49e   :  { %3080 = vmatpush1.bf16.msra.mxu0 %v3702_v35  ;;  %3109 = vmatpush3.bf16.msra.mxu1 %v3777_v12 }
 0x49f   :  { %3082 = vmatprep.subr.bf16.mxu0 %v3705_v37  ;;  %3110 = vmatprep.subr.bf16.mxu1 %v3552_v6 }
 0x4a2   :  { %3084 = vmatpush1.bf16.msra.mxu0 %v3714_v43  ;;  %3112 = vmatpush3.bf16.msra.mxu1 %v3781_v16 }
 0x4a3   :  { %3086 = vmatprep.subr.bf16.mxu0 %v3717_v44  ;;  %3113 = vmatprep.subr.bf16.mxu1 %v3552_v6 }
 0x4a6   :  { %3088 = vmatpush1.bf16.msra.mxu0 %v3725_v49  ;;  %3115 = vmatpush3.bf16.msra.mxu1 %v3785_v20 }
 0x4a7   :  { %3090 = vmatprep.subr.bf16.mxu0 %v3729_v50  ;;  %3116 = vmatprep.subr.bf16.mxu1 %v3552_v6 }
 0x4aa   :  { %3092 = vmatpush1.bf16.msra.mxu0 %v3736_v55  ;;  %3118 = vmatpush3.bf16.msra.mxu1 %v3789_v24 }
 0x4ab   :  { %3094 = vmatprep.subr.bf16.mxu0 %v3739_v56  ;;  %3119 = vmatprep.subr.bf16.mxu1 %v3552_v6 }
 0x4ae   :  { %3096 = vmatpush1.bf16.msra.mxu0 %v3746_v61  ;;  %3121 = vmatpush3.bf16.msra.mxu1 %v3793_v28 }
 0x4af   :  { %3098 = vmatprep.subr.bf16.mxu0 %v3749_v62  ;;  %3122 = vmatprep.subr.bf16.mxu1 %v3552_v6 }
 0x4b2   :  { %3100 = vmatpush1.bf16.msra.mxu0 %v3756_v2  ;;  %3124 = vmatpush3.bf16.msra.mxu1 %v3797_v32 }
 0x4b3   :  { %3126 = vmatprep.subr.bf16.mxu0 %v3677_v15  ;;  %3157 = vmatprep.subr.bf16.mxu1 %v3552_v6 }
 0x568   :  { %v1232_v25 = vpop.f32.mrb[22].mxu0  ;;  %v1303_v54 = vpop.f32.mrb[18].mxu1 }
 0x569   :  { %v1310_v63 = vadd.f32 %v3879_v4, %v1232_v25  ;;  %v1234_v51 = vpop.f32.mrb[23].mxu0  ;;  %v2587_v31 = vpop.f32.mrb[19].mxu1  ;;  %v1330_v59 = vadd.f32 %v3946_v39, %v1303_v54 }
 0x56a   :  { %v1320_v36 = vadd.f32 %v3887_v47, %v1234_v51 }
 0x56b   :  { %v2194_v46 = vmul.f32 -1.442695, %v1310_v63 }
 0x56c   :  { %v2195_v38 = vmul.f32 -1.442695, %v1320_v36 }
 0x56d   :  { %3362 = vpow2.f32 %v2194_v46 }
 0x56e   :  { %3364 = vpow2.f32 %v2195_v38 }
 0x577   :  { %v3363_v52 = vpop.eup %3362 }
 0x578   :  { %v1314_v42 = vadd.f32 1.0, %v3363_v52  ;;  %v3365_v45 = vpop.eup %3364 }
 0x579   :  { %v1324_v7 = vadd.f32 1.0, %v3365_v45 }
 0x57a   :  { %3366 = vrcp.f32 %v1314_v42 }
 0x57b   :  { %3368 = vrcp.f32 %v1324_v7 }
 0x584   :  { %v3367_v23 = vpop.eup %3366 }
 0x585   :  { %v1331_v60 = vmul.f32 %v3367_v23, %v1330_v59  ;;  %v3369_v3 = vpop.eup %3368 }
 0x586   :  { %v1334_v1 = vsub.f32 1.0, %v3369_v3  ;;  %v1336_v10 = vmul.f32 %v3369_v3, %v4081_v19 }
 0x587   :  { %v1332_v4 = vadd.f32 %v1331_v60, %v3853_v26 }
 0x589   :  { %3370 = vtanh.f32 %v1332_v4 }
 0x593   :  { %v3371_v47 = vpop.eup %3370 }
 0x594   :  { %v1335_v33 = vmul.f32 %v3371_v47, %v1334_v1  ;;  %v1906_v1 = vld [vmem:[#allocation13 + $0x28] sm:$0xff] }
 0x596   :  { %v4125_v58 = vadd.f32 %v1336_v10, %v1335_v33  ;;  %v1907_v33 = vld [vmem:[#allocation13 + $0x30] sm:$0xff]  ;;  %v1908_v10 = vld [vmem:[#allocation13 + $0x38] sm:$0xff] }
 0x598   :  { %1407 = vmatmul.mubr.f32.vlgmr.msra.gmra.mrb[24].mxu0 %v4125_v58  ;;  %2621 = vmatmul.mubr.f32.vlgmr.msra.gmra.mrb[20].mxu1 %v4125_v58 }
 0x599   :  { %3128 = vmatpush1.bf16.msra.mxu0 %v3679_v18  ;;  %3159 = vmatpush3.bf16.msra.mxu1 %v3764_v5 }
 0x59a   :  { %3130 = vmatprep.subr.bf16.mxu0 %v3682_v21  ;;  %3160 = vmatprep.subr.bf16.mxu1 %v3552_v6 }
 0x59b   :  { %1582 = vmatprep.mubr.f32.mxu0 %v3551_v0  ;;  %2655 = vmatprep.mubr.msk.f32.mxu1 %vm3553_vm1, %v3551_v0 }
 0x59d   :  { %3132 = vmatpush1.bf16.msra.mxu0 %v3690_v27  ;;  %3162 = vmatpush3.bf16.msra.mxu1 %v3771_v9 }
 0x59e   :  { %3134 = vmatprep.subr.bf16.mxu0 %v3693_v29  ;;  %3163 = vmatprep.subr.bf16.mxu1 %v3552_v6 }
 0x5a1   :  { %3136 = vmatpush1.bf16.msra.mxu0 %v3702_v35  ;;  %3165 = vmatpush3.bf16.msra.mxu1 %v3777_v12 }
 0x5a2   :  { %3138 = vmatprep.subr.bf16.mxu0 %v3705_v37  ;;  %3166 = vmatprep.subr.bf16.mxu1 %v3552_v6 }
 0x5a5   :  { %3140 = vmatpush1.bf16.msra.mxu0 %v3714_v43  ;;  %3168 = vmatpush3.bf16.msra.mxu1 %v3781_v16 }
 0x5a6   :  { %3142 = vmatprep.subr.bf16.mxu0 %v3717_v44  ;;  %3169 = vmatprep.subr.bf16.mxu1 %v3552_v6 }
 0x5a9   :  { %3144 = vmatpush1.bf16.msra.mxu0 %v3725_v49  ;;  %3171 = vmatpush3.bf16.msra.mxu1 %v3785_v20 }
 0x5aa   :  { %3146 = vmatprep.subr.bf16.mxu0 %v3729_v50  ;;  %3172 = vmatprep.subr.bf16.mxu1 %v3552_v6 }
 0x5ad   :  { %3148 = vmatpush1.bf16.msra.mxu0 %v3736_v55  ;;  %3174 = vmatpush3.bf16.msra.mxu1 %v3789_v24 }
 0x5ae   :  { %3150 = vmatprep.subr.bf16.mxu0 %v3739_v56  ;;  %3175 = vmatprep.subr.bf16.mxu1 %v3552_v6 }
 0x5b1   :  { %3152 = vmatpush1.bf16.msra.mxu0 %v3746_v61  ;;  %3177 = vmatpush3.bf16.msra.mxu1 %v3793_v28 }
 0x5b2   :  { %3154 = vmatprep.subr.bf16.mxu0 %v3749_v62  ;;  %3178 = vmatprep.subr.bf16.mxu1 %v3552_v6 }
 0x5b5   :  { %3156 = vmatpush1.bf16.msra.mxu0 %v3756_v2  ;;  %3180 = vmatpush3.bf16.msra.mxu1 %v3797_v32 }
 0x5b6   :  { %3182 = vmatprep.subr.bf16.mxu0 %v3677_v15  ;;  %3213 = vmatprep.subr.bf16.mxu1 %v3552_v6 }
 0x66b   :  { %v1408_v26 = vpop.f32.mrb[24].mxu0  ;;  %v1479_v57 = vpop.f32.mrb[20].mxu1 }
 0x66c   :  { %v1486_v25 = vadd.f32 %v3897_v30, %v1408_v26  ;;  %v1410_v54 = vpop.f32.mrb[25].mxu0  ;;  %v2622_v63 = vpop.f32.mrb[21].mxu1  ;;  %v1506_v15 = vadd.f32 %v3946_v39, %v1479_v57  ;;  %v3249_v26 = vpack.c.bf16 %v1908_v10, %v1907_v33  ;;  %v1909_v57 = vld [vmem:[#allocation13 + $0x40] sm:$0xff]  ;;  %v1899_v10 = vld [vmem:[#allocation11 + $0x70] sm:$0xff] }
 0x66d   :  { %v1496_v51 = vadd.f32 %v3905_v34, %v1410_v54  ;;  %v1911_v63 = vld [vmem:[#allocation13 + $0x50] sm:$0xff] }
 0x66e   :  { %v2196_v31 = vmul.f32 -1.442695, %v1486_v25  ;;  %v1910_v25 = vld [vmem:[#allocation13 + $0x48] sm:$0xff] }
 0x66f   :  { %v2197_v36 = vmul.f32 -1.442695, %v1496_v51  ;;  %v3253_v54 = vpack.c.bf16 %v1910_v25, %v1909_v57  ;;  %v1912_v51 = vld [vmem:[#allocation13 + $0x58] sm:$0xff] }
 0x670   :  { %3372 = vpow2.f32 %v2196_v31  ;;  %v1913_v31 = vld [vmem:[#allocation13 + $0x60] sm:$0xff] }
 0x671   :  { %3374 = vpow2.f32 %v2197_v36  ;;  %v3257_v36 = vpack.c.bf16 %v1912_v51, %v1911_v63 }
 0x67a   :  { %v3373_v46 = vpop.eup %3372 }
 0x67b   :  { %v1490_v38 = vadd.f32 1.0, %v3373_v46  ;;  %v3375_v52 = vpop.eup %3374  ;;  %v1914_v46 = vld [vmem:[#allocation13 + $0x68] sm:$0xff] }
 0x67c   :  { %v1500_v42 = vadd.f32 1.0, %v3375_v52  ;;  %v1915_v52 = vld [vmem:[#allocation13 + $0x70] sm:$0xff] }
 0x67d   :  { %3376 = vrcp.f32 %v1490_v38  ;;  %v3261_v38 = vpack.c.bf16 %v1914_v46, %v1913_v31 }
 0x67e   :  { %3378 = vrcp.f32 %v1500_v42  ;;  %v1916_v42 = vld [vmem:[#allocation13 + $0x78] sm:$0xff] }
 0x687   :  { %v3377_v45 = vpop.eup %3376 }
 0x688   :  { %v1507_v7 = vmul.f32 %v3377_v45, %v1506_v15  ;;  %v3379_v59 = vpop.eup %3378  ;;  %v3265_v15 = vpack.c.bf16 %v1916_v42, %v1915_v52  ;;  %v1885_v45 = vld [vmem:[#allocation11] sm:$0xff] }
 0x689   :  { %v1510_v23 = vsub.f32 1.0, %v3379_v59  ;;  %v1512_v4 = vmul.f32 %v3379_v59, %v4125_v58 }
 0x68a   :  { %v1508_v30 = vadd.f32 %v1507_v7, %v3845_v22  ;;  %v1903_v22 = vld [vmem:[#allocation13 + $0x10] sm:$0xff]  ;;  %v1886_v7 = vld [vmem:[#allocation11 + $0x8] sm:$0xff] }
 0x68c   :  { %3380 = vtanh.f32 %v1508_v30  ;;  %v3269_v30 = vpack.c.bf16 %v1886_v7, %v1885_v45 }
 0x696   :  { %v3381_v34 = vpop.eup %3380 }
 0x697   :  { %v1511_v60 = vmul.f32 %v3381_v34, %v1510_v23 }
 0x699   :  { %v4169_v3 = vadd.f32 %v1512_v4, %v1511_v60 }
 0x69b   :  { %1583 = vmatmul.mubr.f32.vlgmr.msra.gmra.mrb[26].mxu0 %v4169_v3  ;;  %2656 = vmatmul.mubr.f32.vlgmr.msra.gmra.mrb[22].mxu1 %v4169_v3 }
 0x69c   :  { %3184 = vmatpush1.bf16.msra.mxu0 %v3679_v18  ;;  %3215 = vmatpush3.bf16.msra.mxu1 %v3764_v5 }
 0x69d   :  { %3186 = vmatprep.subr.bf16.mxu0 %v3682_v21  ;;  %3216 = vmatprep.subr.bf16.mxu1 %v3552_v6 }
 0x69e   :  { %1758 = vmatprep.mubr.f32.mxu0 %v3551_v0  ;;  %2690 = vmatprep.mubr.msk.f32.mxu1 %vm3553_vm1, %v3551_v0 }
 0x6a0   :  { %3188 = vmatpush1.bf16.msra.mxu0 %v3690_v27  ;;  %3218 = vmatpush3.bf16.msra.mxu1 %v3771_v9 }
 0x6a1   :  { %3190 = vmatprep.subr.bf16.mxu0 %v3693_v29  ;;  %3219 = vmatprep.subr.bf16.mxu1 %v3552_v6 }
 0x6a4   :  { %3192 = vmatpush1.bf16.msra.mxu0 %v3702_v35  ;;  %3221 = vmatpush3.bf16.msra.mxu1 %v3777_v12 }
 0x6a5   :  { %3194 = vmatprep.subr.bf16.mxu0 %v3705_v37  ;;  %3222 = vmatprep.subr.bf16.mxu1 %v3552_v6 }
 0x6a8   :  { %3196 = vmatpush1.bf16.msra.mxu0 %v3714_v43  ;;  %3224 = vmatpush3.bf16.msra.mxu1 %v3781_v16 }
 0x6a9   :  { %3198 = vmatprep.subr.bf16.mxu0 %v3717_v44  ;;  %3225 = vmatprep.subr.bf16.mxu1 %v3552_v6 }
 0x6ac   :  { %3200 = vmatpush1.bf16.msra.mxu0 %v3725_v49  ;;  %3227 = vmatpush3.bf16.msra.mxu1 %v3785_v20 }
 0x6ad   :  { %3202 = vmatprep.subr.bf16.mxu0 %v3729_v50  ;;  %3228 = vmatprep.subr.bf16.mxu1 %v3552_v6 }
 0x6b0   :  { %3204 = vmatpush1.bf16.msra.mxu0 %v3736_v55  ;;  %3230 = vmatpush3.bf16.msra.mxu1 %v3789_v24  ;;  %v1901_v24 = vld [vmem:[#allocation13] sm:$0xff] }
 0x6b1   :  { %3206 = vmatprep.subr.bf16.mxu0 %v3739_v56  ;;  %3231 = vmatprep.subr.bf16.mxu1 %v3552_v6 }
 0x6b4   :  { %3208 = vmatpush1.bf16.msra.mxu0 %v3746_v61  ;;  %3233 = vmatpush3.bf16.msra.mxu1 %v3793_v28  ;;  %v1902_v28 = vld [vmem:[#allocation13 + $0x8] sm:$0xff] }
 0x6b5   :  { %3210 = vmatprep.subr.bf16.mxu0 %v3749_v62  ;;  %3234 = vmatprep.subr.bf16.mxu1 %v3552_v6 }
 0x6b8   :  { %3212 = vmatpush1.bf16.msra.mxu0 %v3756_v2  ;;  %3236 = vmatpush3.bf16.msra.mxu1 %v3797_v32  ;;  %v3237_v32 = vpack.c.bf16 %v1902_v28, %v1901_v24  ;;  %v1893_v28 = vld [vmem:[#allocation11 + $0x40] sm:$0xff] }
 0x6ba   :  { %3238 = vmatprep.subr.bf16.mxu0 %v3237_v32 }
 0x76e   :  { %v1584_v0 = vpop.f32.mrb[26].mxu0  ;;  %v1655_v18 = vpop.f32.mrb[22].mxu1 }
 0x76f   :  { %v1662_v21 = vadd.f32 %v3915_v8, %v1584_v0  ;;  %v1586_v27 = vpop.f32.mrb[27].mxu0  ;;  %v2657_v29 = vpop.f32.mrb[23].mxu1  ;;  %v1682_v56 = vadd.f32 %v3946_v39, %v1655_v18 }
 0x770   :  { %v1672_v35 = vadd.f32 %v3923_v14, %v1586_v27  ;;  %v1905_v14 = vld [vmem:[#allocation13 + $0x20] sm:$0xff] }
 0x771   :  { %v2198_v37 = vmul.f32 -1.442695, %v1662_v21  ;;  %v3245_v47 = vpack.c.bf16 %v1906_v1, %v1905_v14  ;;  %v1897_v1 = vld [vmem:[#allocation11 + $0x60] sm:$0xff] }
 0x772   :  { %v2199_v43 = vmul.f32 -1.442695, %v1672_v35 }
 0x773   :  { %3382 = vpow2.f32 %v2198_v37 }
 0x774   :  { %3384 = vpow2.f32 %v2199_v43 }
 0x77d   :  { %v3383_v44 = vpop.eup %3382 }
 0x77e   :  { %v1666_v49 = vadd.f32 1.0, %v3383_v44  ;;  %v3385_v50 = vpop.eup %3384 }
 0x77f   :  { %v1676_v55 = vadd.f32 1.0, %v3385_v50 }
 0x780   :  { %3386 = vrcp.f32 %v1666_v49 }
 0x781   :  { %3388 = vrcp.f32 %v1676_v55 }
 0x78a   :  { %v3387_v61 = vpop.eup %3386 }
 0x78b   :  { %v1683_v62 = vmul.f32 %v3387_v61, %v1682_v56  ;;  %v3389_v5 = vpop.eup %3388 }
 0x78c   :  { %v1686_v6 = vsub.f32 1.0, %v3389_v5  ;;  %v1688_v16 = vmul.f32 %v3389_v5, %v4169_v3 }
 0x78d   :  { %v1684_v2 = vadd.f32 %v1683_v62, %v3869_v48  ;;  %v1904_v48 = vld [vmem:[#allocation13 + $0x18] sm:$0xff]  ;;  %v1887_v62 = vld [vmem:[#allocation11 + $0x10] sm:$0xff] }
 0x78e   :  { %v3241_v8 = vpack.c.bf16 %v1904_v48, %v1903_v22  ;;  %v1895_v48 = vld [vmem:[#allocation11 + $0x50] sm:$0xff] }
 0x78f   :  { %3390 = vtanh.f32 %v1684_v2  ;;  %v1888_v2 = vld [vmem:[#allocation11 + $0x18] sm:$0xff] }
 0x799   :  { %v3391_v9 = vpop.eup %3390 }
 0x79a   :  { %v1687_v12 = vmul.f32 %v3391_v9, %v1686_v6  ;;  %v3273_v6 = vpack.c.bf16 %v1888_v2, %v1887_v62  ;;  %v1889_v9 = vld [vmem:[#allocation11 + $0x20] sm:$0xff] }
 0x79c   :  { %v4211_v20 = vadd.f32 %v1688_v16, %v1687_v12  ;;  %v1890_v12 = vld [vmem:[#allocation11 + $0x28] sm:$0xff]  ;;  %v1892_v16 = vld [vmem:[#allocation11 + $0x38] sm:$0xff] }
 0x79e   :  { %1759 = vmatmul.mubr.f32.vlgmr.msra.gmra.mrb[28].mxu0 %v4211_v20  ;;  %2691 = vmatmul.mubr.f32.vlgmr.msra.gmra.mrb[24].mxu1 %v4211_v20 }
 0x79f   :  { %3240 = vmatpush3.bf16.msra.mxu0 %v3237_v32  ;;  %v1894_v32 = vld [vmem:[#allocation11 + $0x48] sm:$0xff] }
 0x7a0   :  { %3242 = vmatprep.subr.bf16.mxu0 %v3241_v8  ;;  %v3285_v22 = vpack.c.bf16 %v1894_v32, %v1893_v28 }
 0x7a3   :  { %3244 = vmatpush3.bf16.msra.mxu0 %v3241_v8  ;;  %v1896_v8 = vld [vmem:[#allocation11 + $0x58] sm:$0xff] }
 0x7a4   :  { %3246 = vmatprep.subr.bf16.mxu0 %v3245_v47  ;;  %v3289_v14 = vpack.c.bf16 %v1896_v8, %v1895_v48 }
 0x7a7   :  { %3248 = vmatpush3.bf16.msra.mxu0 %v3245_v47  ;;  %v1898_v47 = vld [vmem:[#allocation11 + $0x68] sm:$0xff] }
 0x7a8   :  { %3250 = vmatprep.subr.bf16.mxu0 %v3249_v26  ;;  %v3293_v33 = vpack.c.bf16 %v1898_v47, %v1897_v1 }
 0x7ab   :  { %3252 = vmatpush3.bf16.msra.mxu0 %v3249_v26  ;;  %v1900_v26 = vld [vmem:[#allocation11 + $0x78] sm:$0xff] }
 0x7ac   :  { %3254 = vmatprep.subr.bf16.mxu0 %v3253_v54  ;;  %v3297_v57 = vpack.c.bf16 %v1900_v26, %v1899_v10 }
 0x7af   :  { %3256 = vmatpush3.bf16.msra.mxu0 %v3253_v54 }
 0x7b0   :  { %3258 = vmatprep.subr.bf16.mxu0 %v3257_v36 }
 0x7b3   :  { %3260 = vmatpush3.bf16.msra.mxu0 %v3257_v36 }
 0x7b4   :  { %3262 = vmatprep.subr.bf16.mxu0 %v3261_v38 }
 0x7b7   :  { %3264 = vmatpush3.bf16.msra.mxu0 %v3261_v38 }
 0x7b8   :  { %3266 = vmatprep.subr.bf16.mxu0 %v3265_v15 }
 0x7bb   :  { %3268 = vmatpush3.bf16.msra.mxu0 %v3265_v15 }
 0x7bc   :  { %3270 = vmatprep.subr.bf16.mxu0 %v3269_v30 }
 0x871   :  { %v1760_v59 = vpop.f32.mrb[28].mxu0  ;;  %v1831_v23 = vpop.f32.mrb[24].mxu1 }
 0x872   :  { %v1838_v34 = vadd.f32 %v3935_v17, %v1760_v59  ;;  %v1762_v60 = vpop.f32.mrb[29].mxu0  ;;  %v2692_v4 = vpop.f32.mrb[25].mxu1  ;;  %v1858_v43 = vadd.f32 %v3946_v39, %v1831_v23  ;;  %v1891_v39 = vld [vmem:[#allocation11 + $0x30] sm:$0xff] }
 0x873   :  { %v1848_v0 = vadd.f32 %v3941_v41, %v1762_v60  ;;  %v3281_v24 = vpack.c.bf16 %v1892_v16, %v1891_v39 }
 0x874   :  { %v2200_v18 = vmul.f32 -1.442695, %v1838_v34 }
 0x875   :  { %v2201_v21 = vmul.f32 -1.442695, %v1848_v0 }
 0x876   :  { %3392 = vpow2.f32 %v2200_v18 }
 0x877   :  { %3394 = vpow2.f32 %v2201_v21 }
 0x880   :  { %v3393_v27 = vpop.eup %3392 }
 0x881   :  { %v1842_v29 = vadd.f32 1.0, %v3393_v27  ;;  %v3395_v35 = vpop.eup %3394 }
 0x882   :  { %v1852_v37 = vadd.f32 1.0, %v3395_v35 }
 0x883   :  { %3396 = vrcp.f32 %v1842_v29 }
 0x884   :  { %3398 = vrcp.f32 %v1852_v37 }
 0x88d   :  { %v3397_v44 = vpop.eup %3396 }
 0x88e   :  { %v1859_v49 = vmul.f32 %v3397_v44, %v1858_v43  ;;  %v3399_v50 = vpop.eup %3398 }
 0x88f   :  { %v1862_v55 = vsub.f32 1.0, %v3399_v50  ;;  %v1864_v61 = vmul.f32 %v3399_v50, %v4211_v20 }
 0x890   :  { %v1860_v17 = vadd.f32 %v1859_v49, %v3861_v53  ;;  %v3277_v53 = vpack.c.bf16 %v1890_v12, %v1889_v9 }
 0x892   :  { %3400 = vtanh.f32 %v1860_v17 }
 0x89c   :  { %v3401_v41 = vpop.eup %3400 }
 0x89d   :  { %v1863_v56 = vmul.f32 %v3401_v41, %v1862_v55 }
 0x89f   :  { %v1865_v5 = vadd.f32 %v1864_v61, %v1863_v56 }
 0x8a1   :  { %2725 = vmatprep.mubr.f32.mxu0 %v1865_v5 }
 0x8a2   :  { %2726 = vmatmul.mubr.f32.vlgmr.msra.gmra.mrb[30].mxu0 %v4211_v20 }
 0x8a3   :  { %3272 = vmatpush3.bf16.msra.mxu0 %v3269_v30  ;;  %2728 = vmatprep.mubr.f32.mxu0 %v4169_v3 }
 0x8a4   :  { %3274 = vmatprep.subr.bf16.mxu0 %v3273_v6 }
 0x8a6   :  { %2729 = vmatmul.mubr.f32.gmra.mrb[32].mxu0 %v4125_v58 }
 0x8a7   :  { %3276 = vmatpush3.bf16.msra.mxu0 %v3273_v6  ;;  %2731 = vmatprep.mubr.f32.mxu0 %v4081_v19 }
 0x8a8   :  { %3278 = vmatprep.subr.bf16.mxu0 %v3277_v53 }
 0x8aa   :  { %2732 = vmatmul.mubr.f32.gmra.mrb[34].mxu0 %v4037_v13 }
 0x8ab   :  { %3280 = vmatpush3.bf16.msra.mxu0 %v3277_v53  ;;  %2734 = vmatprep.mubr.f32.mxu0 %v3993_v11 }
 0x8ac   :  { %3282 = vmatprep.subr.bf16.mxu0 %v3281_v24 }
 0x8ae   :  { %2735 = vmatmul.mubr.f32.gmra.mrb[36].mxu0 %v3949_v40 }
 0x8af   :  { %3284 = vmatpush3.bf16.msra.mxu0 %v3281_v24  ;;  %2769 = vmatprep.mubr.f32.mxu0 %v3949_v40  ;;  %v2202_v40 = vld [vmem:[%s4259_s7] ss:$0 sm:$0xff]  ;;  %s3512_s7 = scalar_lea.vmem %s2156_s29, 1024 }
 0x8b0   :  { %3286 = vmatprep.subr.bf16.mxu0 %v3285_v22  ;;  %p3513_p12 = scmp.ne.s32.totalorder %s2156_s29, %s3512_s7  ;;  %p3518_p0 = scmp.lt.s32.totalorder %s3512_s7, %s3512_s7 }
 0x8b2   :  { %p3519_p1 = por %p3518_p0, %p3517_p13 }
 0x8b3   :  { %3288 = vmatpush3.bf16.msra.mxu0 %v3285_v22 }
 0x8b4   :  { %3290 = vmatprep.subr.bf16.mxu0 %v3289_v14  ;;  %p3520_p2 = pnand %p3519_p1, %p3513_p12 }
 0x8b7   :  { %3292 = vmatpush3.bf16.msra.mxu0 %v3289_v14 }
 0x8b8   :  { %3294 = vmatprep.subr.bf16.mxu0 %v3293_v33 }
 0x8bb   :  { %3296 = vmatpush3.bf16.msra.mxu0 %v3293_v33 }
 0x8bc   :  { %3298 = vmatprep.subr.bf16.mxu0 %v3297_v57 }
 0x8bf   :  { %3300 = vmatpush3.bf16.msra.mxu0 %v3297_v57 }
 0x8c2   :  { %2770 = vmatmul.mubr.f32.vlgmr.msra.gmra.mrb[30].mxu0 %v3993_v11 }
 0x8c3   :  { %2772 = vmatprep.mubr.f32.mxu0 %v4037_v13 }
 0x8c6   :  { %2773 = vmatmul.mubr.f32.gmra.mrb[32].mxu0 %v4081_v19 }
 0x8c7   :  { %2775 = vmatprep.mubr.f32.mxu0 %v4125_v58 }
 0x8ca   :  { %2776 = vmatmul.mubr.f32.gmra.mrb[34].mxu0 %v4169_v3 }
 0x8cb   :  { %2778 = vmatprep.mubr.f32.mxu0 %v4211_v20 }
 0x8ce   :  { %2779 = vmatmul.mubr.f32.gmra.mrb[36].mxu0 %v1865_v5 }
 0x995   :  { %v2771_v25 = vpop.f32.mrb[30].mxu0 }
 0x996   :  { %v2135_v54 = vadd.f32 %v2771_v25, %v2202_v40  ;;  %v2088_v63 = vpop.f32.mrb[31].mxu0 }
 0x997   :  { %v2134_v51 = vadd.f32 %v2202_v40, %v2088_v63 }
 0x998   :  { %2143 = vst [vmem:[#allocation14 + $0x8] sm:$0xff] %v2135_v54 }
 0x999   :  { %2142 = vst [vmem:[#allocation14] sm:$0xff] %v2134_v51  ;;  %v2774_v11 = vpop.f32.mrb[32].mxu0 }
 0x99a   :  { %v2137_v13 = vadd.f32 %v2774_v11, %v2202_v40  ;;  %v2098_v19 = vpop.f32.mrb[33].mxu0 }
 0x99b   :  { %v2136_v31 = vadd.f32 %v2202_v40, %v2098_v19 }
 0x99c   :  { %2145 = vst [vmem:[#allocation14 + $0x18] sm:$0xff] %v2137_v13 }
 0x99d   :  { %2144 = vst [vmem:[#allocation14 + $0x10] sm:$0xff] %v2136_v31  ;;  %v2777_v58 = vpop.f32.mrb[34].mxu0 }
 0x99e   :  { %v2139_v3 = vadd.f32 %v2777_v58, %v2202_v40  ;;  %v2108_v20 = vpop.f32.mrb[35].mxu0 }
 0x99f   :  { %v2138_v36 = vadd.f32 %v2202_v40, %v2108_v20 }
 0x9a0   :  { %2147 = vst [vmem:[#allocation14 + $0x28] sm:$0xff] %v2139_v3 }
 0x9a1   :  { %2146 = vst [vmem:[#allocation14 + $0x20] sm:$0xff] %v2138_v36  ;;  %v2780_v46 = vpop.f32.mrb[36].mxu0 }
 0x9a2   :  { %v2141_v38 = vadd.f32 %v2780_v46, %v2202_v40  ;;  %v2118_v52 = vpop.f32.mrb[37].mxu0 }
 0x9a3   :  { %v2140_v42 = vadd.f32 %v2202_v40, %v2118_v52 }
 0x9a4   :  { %2149 = vst [vmem:[#allocation14 + $0x38] sm:$0xff] %v2141_v38 }
 0x9a5   :  { %2148 = vst [vmem:[#allocation14 + $0x30] sm:$0xff] %v2140_v42 }
 0x9a6   :  { %3523 = shalt.err (!%p3520_p2)
}
 0x9a7   :  { %s3524_s10 = scalar_lea.hbm %s4260_s8, 1024 }
 0x9a8   :  { %p3525_p3 = scmp.ne.s32.totalorder %s4260_s8, %s3524_s10  ;;  %p3528_p4 = scmp.lt.u32.totalorder %s3524_s10, %s4260_s8 }
 0x9aa   :  { %p3530_p5 = pnand %p3528_p4, %p3525_p3 }
 0x9ac   :  { %3533 = shalt.err (!%p3530_p5)
}
 0x9ad   :  { %2161 = dma.vmem_to_hbm [thread:$0]  %s2156_s29, 1024, %s4260_s8, [#allocation7], %s3547_s28, %s3547_s28, %s3548_s9  }
 0x9ae   :  { %3540 = dma.done.wait [#allocation7], 1024  }
 0x9af   :  { %3541 = vsyncadd [#allocation7], 4294966272 }
 0x9b0   :  { %2165 = vsyncpa [#allocation6], 1 }
 0x9b1   :  { %2166 = vsyncpa [#allocation9], 1 }
 0x9b2   :  { %2167 = vsyncpa [#allocation12], 1 }
 0x9b3   :  { %2168 = vsyncpa [#allocation7], 1 }

</bundles_post_ra>
